<compile_context>
chip_gen: v7x
topology: tpu7x:2x2x1
jax: 0.10.0
libtpu: 0.0.40
codegen_flags: <defaults>
</compile_context>

<pallas_src>
import math

import jax
import jax.numpy as jnp
from jax.experimental import pallas as pl
from jax.experimental.pallas import tpu as pltpu

# ----------------------------- model config ---------------------------------
VOCAB = 100
TYPE_VOCAB = 2
MAX_POS = 32
HIDDEN = 32
NUM_HEADS = 2
HEAD_DIM = HIDDEN // NUM_HEADS
NUM_LAYERS = 2
INTERMEDIATE = 64
NUM_TAGS = 5
LN_EPS = 1e-12
IGNORE_INDEX = -100        # nn.CrossEntropyLoss default
EMB_ROWS = 136             # 100 word + 32 pos + 2 type, padded to a multiple of 8
LOGIT_PAD = 128            # classifier output padded to a full lane tile


def _full(shape):
    """BlockSpec covering the whole array (single block, grid=(1,))."""
    return pl.BlockSpec(shape, lambda i, _n=len(shape): (0,) * _n)


# ----------------------------- fused kernel ----------------------------------
def _gelu(x):
    # TODO(synk): HF BERT's default activation is exact erf GELU; tanh approximation
    # is used here because erf has no guaranteed Mosaic lowering at this version.
    return jax.nn.gelu(x, approximate=True)


def _layernorm(x, g, b):
    mu = jnp.mean(x, axis=-1, keepdims=True)
    d = x - mu
    var = jnp.mean(d * d, axis=-1, keepdims=True)
    return d * jax.lax.rsqrt(var + LN_EPS) * g + b


def _fused_forward_kernel(
    # inputs
    ids_ref, types_ref, pos_ref, bid_ref, bidt_ref, kmask_ref,
    labels_ref, lmask_ref,
    emb_ref, eg_ref, eb_ref,
    wqkv_ref, bqkv_ref, wo_ref, bo_ref,
    ln1g_ref, ln1b_ref, w1_ref, b1_ref, w2_ref, b2_ref,
    ln2g_ref, ln2b_ref, ow_ref, ob_ref,
    # outputs
    hid_ref, logits_ref, avg_ref, items_ref,
):
    f32 = jnp.float32
    n = ids_ref.shape[0]

    # ---- embedding lookup as a single one-hot MXU matmul (no gathers) ----
    ids = ids_ref[...]                                     # (N,1) int32
    typ = types_ref[...]                                   # (N,1) int32
    pos = pos_ref[...]                                     # (N,1) int32 (constant)
    col = jax.lax.broadcasted_iota(jnp.int32, (n, EMB_ROWS), 1)
    hot = ((col == ids)
           | (col == VOCAB + pos)
           | (col == VOCAB + MAX_POS + typ)).astype(f32)   # 3 ones per row
    x = jnp.dot(hot, emb_ref[...], preferred_element_type=f32)       # (N, H)
    x = _layernorm(x, eg_ref[...], eb_ref[...])

    # ---- block-diagonal additive attention mask (built once, reused everywhere) ----
    same_example = bid_ref[...] == bidt_ref[...]           # (N,N) bool
    key_valid = kmask_ref[...] > 0.5                       # (1,N) bool
    addmask = jnp.where(same_example & key_valid, 0.0, -10000.0).astype(f32)

    for l in range(NUM_LAYERS):
        # fused QKV projection (1/sqrt(head_dim) pre-folded into the Q weight/bias)
        qkv = jnp.dot(x, wqkv_ref[l], preferred_element_type=f32) + bqkv_ref[l]  # (N,3H)

        # attention, batched over the batch dimension per head
        ctx_heads = []
        for h in range(NUM_HEADS):
            c0 = h * HEAD_DIM
            qh = qkv[:, c0:c0 + HEAD_DIM]                               # (N, Dh)
            kh = qkv[:, HIDDEN + c0:HIDDEN + c0 + HEAD_DIM]
            vh = qkv[:, 2 * HIDDEN + c0:2 * HIDDEN + c0 + HEAD_DIM]
            s = jax.lax.dot_general(qh, kh, (((1,), (1,)), ((), ())),
                                    preferred_element_type=f32) + addmask  # (N,N)
            s = s - jnp.max(s, axis=-1, keepdims=True)
            p = jnp.exp(s)
            p = p * pl.reciprocal(jnp.sum(p, axis=-1, keepdims=True), approx=True)
            ctx_heads.append(jnp.dot(p, vh, preferred_element_type=f32))   # (N, Dh)
        ctx = jnp.concatenate(ctx_heads, axis=-1)                          # (N, H)

        attn_out = jnp.dot(ctx, wo_ref[l], preferred_element_type=f32) + bo_ref[l]
        x = _layernorm(x + attn_out, ln1g_ref[l], ln1b_ref[l])

        # feed-forward
        h1 = _gelu(jnp.dot(x, w1_ref[l], preferred_element_type=f32) + b1_ref[l])
        h2 = jnp.dot(h1, w2_ref[l], preferred_element_type=f32) + b2_ref[l]
        x = _layernorm(x + h2, ln2g_ref[l], ln2b_ref[l])

    hid_ref[...] = x

    # ---- output projection (padded classes: weight 0, bias -1e30 -> inert) ----
    # bert_drop: identity (eval-mode dropout)
    # TODO(synk): training-mode dropout RNG not implemented
    logits = jnp.dot(x, ow_ref[...], preferred_element_type=f32) + ob_ref[...]  # (N, 128)
    logits_ref[...] = logits

    # ---- masked cross-entropy (nn.CrossEntropyLoss ignore_index semantics) ----
    labels = labels_ref[...]                                # (N,1) int32
    lmask = lmask_ref[...]                                  # (N,1) int32
    tgt = jnp.where(lmask == 1, labels, IGNORE_INDEX)

    m = jnp.max(logits, axis=-1, keepdims=True)
    z = logits - m
    lse = jnp.log(jnp.sum(jnp.exp(z), axis=-1, keepdims=True))
    logp = z - lse                                          # (N, 128)

    colc = jax.lax.broadcasted_iota(jnp.int32, logits.shape, 1)
    onehot = (colc == tgt).astype(jnp.float32)              # zero row if ignored
    nll = -jnp.sum(onehot * logp, axis=-1, keepdims=True)   # (N, 1)

    valid = (tgt != IGNORE_INDEX).astype(jnp.float32)
    items = nll * valid
    items_ref[...] = items
    count = jnp.sum(valid)
    # TODO(synk): torch gives NaN (0/0) when every position is masked; here we return 0.
    avg_ref[...] = (jnp.sum(items) / jnp.maximum(count, 1.0)).reshape(1, 1)


# ----------------------------- parameters ------------------------------------
def init_params(key):
    """Deterministic init. All kernel-side fusion/stacking/padding is done HERE,
    once, so the jitted forward contains no per-step weight-prep ops."""
    keys = iter(jax.random.split(key, 64))
    std = 0.02

    def w(shape):
        return jax.random.normal(next(keys), shape, jnp.float32) * std

    word = w((VOCAB, HIDDEN))
    posT = w((MAX_POS, HIDDEN))
    typT = w((TYPE_VOCAB, HIDDEN))
    emb_table = jnp.zeros((EMB_ROWS, HIDDEN), jnp.float32)
    emb_table = emb_table.at[:VOCAB].set(word)
    emb_table = emb_table.at[VOCAB:VOCAB + MAX_POS].set(posT)
    emb_table = emb_table.at[VOCAB + MAX_POS:VOCAB + MAX_POS + TYPE_VOCAB].set(typT)

    scale = 1.0 / math.sqrt(HEAD_DIM)
    wqkv, bqkv, wo, bo = [], [], [], []
    ln1g, ln1b, w1, b1, w2, b2, ln2g, ln2b = [], [], [], [], [], [], [], []
    for _ in range(NUM_LAYERS):
        wq, wk, wv = w((HIDDEN, HIDDEN)), w((HIDDEN, HIDDEN)), w((HIDDEN, HIDDEN))
        wqkv.append(jnp.concatenate([wq * scale, wk, wv], axis=1))   # (H, 3H)
        bqkv.append(jnp.zeros((1, 3 * HIDDEN), jnp.float32))
        wo.append(w((HIDDEN, HIDDEN)))
        bo.append(jnp.zeros((1, HIDDEN), jnp.float32))
        ln1g.append(jnp.ones((1, HIDDEN), jnp.float32))
        ln1b.append(jnp.zeros((1, HIDDEN), jnp.float32))
        w1.append(w((HIDDEN, INTERMEDIATE)))
        b1.append(jnp.zeros((1, INTERMEDIATE), jnp.float32))
        w2.append(w((INTERMEDIATE, HIDDEN)))
        b2.append(jnp.zeros((1, HIDDEN), jnp.float32))
        ln2g.append(jnp.ones((1, HIDDEN), jnp.float32))
        ln2b.append(jnp.zeros((1, HIDDEN), jnp.float32))

    # output_layer: xavier_normal_ weight, zero bias; padded to a full 128-lane tile
    xavier_std = math.sqrt(2.0 / (HIDDEN + NUM_TAGS))
    ow = jax.random.normal(next(keys), (HIDDEN, NUM_TAGS), jnp.float32) * xavier_std
    out_w = jnp.zeros((HIDDEN, LOGIT_PAD), jnp.float32).at[:, :NUM_TAGS].set(ow)
    out_b = jnp.full((1, LOGIT_PAD), -1e30, jnp.float32).at[0, :NUM_TAGS].set(0.0)

    return {
        "emb_table": emb_table,
        "emb_ln_g": jnp.ones((1, HIDDEN), jnp.float32),
        "emb_ln_b": jnp.zeros((1, HIDDEN), jnp.float32),
        "wqkv": jnp.stack(wqkv), "bqkv": jnp.stack(bqkv),
        "wo": jnp.stack(wo), "bo": jnp.stack(bo),
        "ln1_g": jnp.stack(ln1g), "ln1_b": jnp.stack(ln1b),
        "w1": jnp.stack(w1), "b1": jnp.stack(b1),
        "w2": jnp.stack(w2), "b2": jnp.stack(b2),
        "ln2_g": jnp.stack(ln2g), "ln2_b": jnp.stack(ln2b),
        "out_w": out_w, "out_b": out_b,
    }


# ----------------------------- forward pass -----------------------------------
@jax.jit
def tc_model_forward(params, input_ids, attention_mask, token_type_ids, labels):
    batch, seq = input_ids.shape
    n = batch * seq

    ids = input_ids.reshape(n, 1).astype(jnp.int32)
    typ = token_type_ids.reshape(n, 1).astype(jnp.int32)
    labels_flat = labels.reshape(n, 1).astype(jnp.int32)
    lmask = attention_mask.reshape(n, 1).astype(jnp.int32)     # per-row (query/label) mask
    kmask = attention_mask.reshape(1, n).astype(jnp.float32)   # per-column (key) mask

    # constant helper vectors (folded at compile time under jit)
    pos = jnp.tile(jnp.arange(seq, dtype=jnp.int32), batch).reshape(n, 1)
    bid = (jnp.arange(n, dtype=jnp.int32) // seq).reshape(n, 1)
    bidt = bid.reshape(1, n)

    inputs = (ids, typ, pos, bid, bidt, kmask, labels_flat, lmask,
              params["emb_table"], params["emb_ln_g"], params["emb_ln_b"],
              params["wqkv"], params["bqkv"], params["wo"], params["bo"],
              params["ln1_g"], params["ln1_b"], params["w1"], params["b1"],
              params["w2"], params["b2"], params["ln2_g"], params["ln2_b"],
              params["out_w"], params["out_b"])

    out_shape = (jax.ShapeDtypeStruct((n, HIDDEN), jnp.float32),
                 jax.ShapeDtypeStruct((n, LOGIT_PAD), jnp.float32),
                 jax.ShapeDtypeStruct((1, 1), jnp.float32),
                 jax.ShapeDtypeStruct((n, 1), jnp.float32))

    hid, logits_pad, avg, items = pl.pallas_call(
        _fused_forward_kernel,
        grid=(1,),
        in_specs=[_full(a.shape) for a in inputs],
        out_specs=tuple(_full(s.shape) for s in out_shape),
        out_shape=out_shape,
    )(*inputs)

    return {
        "average_loss": avg[0, 0],
        "losses": items[:, 0],
        "logits": logits_pad[:, :NUM_TAGS].reshape(batch, seq, NUM_TAGS),
        "last_hidden_state": hid.reshape(batch, seq, HIDDEN),
    }


# ----------------------------- main -------------------------------------------
if __name__ == "__main__":
    key = jax.random.PRNGKey(0)
    pkey, ikey, lkey = jax.random.split(key, 3)

    params = init_params(pkey)

    B, S = 2, 8
    input_ids = jax.random.randint(ikey, (B, S), 0, VOCAB, dtype=jnp.int32)
    token_type_ids = jnp.zeros((B, S), jnp.int32)
    attention_mask = jnp.array([[1, 1, 1, 1, 1, 1, 1, 1],
                                [1, 1, 1, 1, 1, 1, 0, 0]], jnp.int32)
    labels = jax.random.randint(lkey, (B, S), 0, NUM_TAGS, dtype=jnp.int32)

    out = tc_model_forward(params, input_ids, attention_mask, token_type_ids, labels)
    out = jax.block_until_ready(out)

    assert out["logits"].shape == (B, S, NUM_TAGS)
    assert out["last_hidden_state"].shape == (B, S, HIDDEN)
    assert out["losses"].shape == (B * S,)
    assert bool(jnp.isfinite(out["average_loss"]))
    # masked-out positions must contribute zero per-item loss
    assert float(jnp.abs(out["losses"][-1])) == 0.0

    print("KERNEL_OK")
</pallas_src>

<mosaic_0001>
module attributes {stable_mosaic.version = 11 : i64} {
  func.func @_fused_forward_kernel(%arg0: i32, %arg1: memref<16x1xi32, #tpu.memory_space<vmem>>, %arg2: memref<16x1xi32, #tpu.memory_space<vmem>>, %arg3: memref<16x1xi32, #tpu.memory_space<vmem>>, %arg4: memref<16x1xi32, #tpu.memory_space<vmem>>, %arg5: memref<1x16xi32, #tpu.memory_space<vmem>>, %arg6: memref<1x16xf32, #tpu.memory_space<vmem>>, %arg7: memref<16x1xi32, #tpu.memory_space<vmem>>, %arg8: memref<16x1xi32, #tpu.memory_space<vmem>>, %arg9: memref<136x32xf32, #tpu.memory_space<vmem>>, %arg10: memref<1x32xf32, #tpu.memory_space<vmem>>, %arg11: memref<1x32xf32, #tpu.memory_space<vmem>>, %arg12: memref<2x32x96xf32, #tpu.memory_space<vmem>>, %arg13: memref<2x1x96xf32, #tpu.memory_space<vmem>>, %arg14: memref<2x32x32xf32, #tpu.memory_space<vmem>>, %arg15: memref<2x1x32xf32, #tpu.memory_space<vmem>>, %arg16: memref<2x1x32xf32, #tpu.memory_space<vmem>>, %arg17: memref<2x1x32xf32, #tpu.memory_space<vmem>>, %arg18: memref<2x32x64xf32, #tpu.memory_space<vmem>>, %arg19: memref<2x1x64xf32, #tpu.memory_space<vmem>>, %arg20: memref<2x64x32xf32, #tpu.memory_space<vmem>>, %arg21: memref<2x1x32xf32, #tpu.memory_space<vmem>>, %arg22: memref<2x1x32xf32, #tpu.memory_space<vmem>>, %arg23: memref<2x1x32xf32, #tpu.memory_space<vmem>>, %arg24: memref<32x128xf32, #tpu.memory_space<vmem>>, %arg25: memref<1x128xf32, #tpu.memory_space<vmem>>, %arg26: memref<16x32xf32, #tpu.memory_space<vmem>>, %arg27: memref<16x128xf32, #tpu.memory_space<vmem>>, %arg28: memref<1x1xf32, #tpu.memory_space<vmem>>, %arg29: memref<16x1xf32, #tpu.memory_space<vmem>>) attributes {dimension_semantics = [#tpu.dimension_semantics<arbitrary>], iteration_bounds = array<i64: 1>, scalar_prefetch = 0 : i64, scratch_operands = 0 : i64, tpu.core_type = #tpu.core_type<tc>, window_params = [{pipeline_mode = #tpu.pipeline_mode<synchronous>, transform_indices = @transform_0, window_bounds = array<i64: 16, 1>}, {pipeline_mode = #tpu.pipeline_mode<synchronous>, transform_indices = @transform_1, window_bounds = array<i64: 16, 1>}, {pipeline_mode = #tpu.pipeline_mode<synchronous>, transform_indices = @transform_2, window_bounds = array<i64: 16, 1>}, {pipeline_mode = #tpu.pipeline_mode<synchronous>, transform_indices = @transform_3, window_bounds = array<i64: 16, 1>}, {pipeline_mode = #tpu.pipeline_mode<synchronous>, transform_indices = @transform_4, window_bounds = array<i64: 1, 16>}, {pipeline_mode = #tpu.pipeline_mode<synchronous>, transform_indices = @transform_5, window_bounds = array<i64: 1, 16>}, {pipeline_mode = #tpu.pipeline_mode<synchronous>, transform_indices = @transform_6, window_bounds = array<i64: 16, 1>}, {pipeline_mode = #tpu.pipeline_mode<synchronous>, transform_indices = @transform_7, window_bounds = array<i64: 16, 1>}, {pipeline_mode = #tpu.pipeline_mode<synchronous>, transform_indices = @transform_8, window_bounds = array<i64: 136, 32>}, {pipeline_mode = #tpu.pipeline_mode<synchronous>, transform_indices = @transform_9, window_bounds = array<i64: 1, 32>}, {pipeline_mode = #tpu.pipeline_mode<synchronous>, transform_indices = @transform_10, window_bounds = array<i64: 1, 32>}, {pipeline_mode = #tpu.pipeline_mode<synchronous>, transform_indices = @transform_11, window_bounds = array<i64: 2, 32, 96>}, {pipeline_mode = #tpu.pipeline_mode<synchronous>, transform_indices = @transform_12, window_bounds = array<i64: 2, 1, 96>}, {pipeline_mode = #tpu.pipeline_mode<synchronous>, transform_indices = @transform_13, window_bounds = array<i64: 2, 32, 32>}, {pipeline_mode = #tpu.pipeline_mode<synchronous>, transform_indices = @transform_14, window_bounds = array<i64: 2, 1, 32>}, {pipeline_mode = #tpu.pipeline_mode<synchronous>, transform_indices = @transform_15, window_bounds = array<i64: 2, 1, 32>}, {pipeline_mode = #tpu.pipeline_mode<synchronous>, transform_indices = @transform_16, window_bounds = array<i64: 2, 1, 32>}, {pipeline_mode = #tpu.pipeline_mode<synchronous>, transform_indices = @transform_17, window_bounds = array<i64: 2, 32, 64>}, {pipeline_mode = #tpu.pipeline_mode<synchronous>, transform_indices = @transform_18, window_bounds = array<i64: 2, 1, 64>}, {pipeline_mode = #tpu.pipeline_mode<synchronous>, transform_indices = @transform_19, window_bounds = array<i64: 2, 64, 32>}, {pipeline_mode = #tpu.pipeline_mode<synchronous>, transform_indices = @transform_20, window_bounds = array<i64: 2, 1, 32>}, {pipeline_mode = #tpu.pipeline_mode<synchronous>, transform_indices = @transform_21, window_bounds = array<i64: 2, 1, 32>}, {pipeline_mode = #tpu.pipeline_mode<synchronous>, transform_indices = @transform_22, window_bounds = array<i64: 2, 1, 32>}, {pipeline_mode = #tpu.pipeline_mode<synchronous>, transform_indices = @transform_23, window_bounds = array<i64: 32, 128>}, {pipeline_mode = #tpu.pipeline_mode<synchronous>, transform_indices = @transform_24, window_bounds = array<i64: 1, 128>}, {pipeline_mode = #tpu.pipeline_mode<synchronous>, transform_indices = @transform_25, window_bounds = array<i64: 16, 32>}, {pipeline_mode = #tpu.pipeline_mode<synchronous>, transform_indices = @transform_26, window_bounds = array<i64: 16, 128>}, {pipeline_mode = #tpu.pipeline_mode<synchronous>, transform_indices = @transform_27, window_bounds = array<i64: 1, 1>}, {pipeline_mode = #tpu.pipeline_mode<synchronous>, transform_indices = @transform_28, window_bounds = array<i64: 16, 1>}]} {
    %c0 = arith.constant 0 : index
    %c0_0 = arith.constant 0 : index
    %0 = vector.load %arg1[%c0, %c0_0] : memref<16x1xi32, #tpu.memory_space<vmem>>, vector<16x1xi32>
    %c0_1 = arith.constant 0 : index
    %c0_2 = arith.constant 0 : index
    %1 = vector.load %arg2[%c0_1, %c0_2] : memref<16x1xi32, #tpu.memory_space<vmem>>, vector<16x1xi32>
    %c0_3 = arith.constant 0 : index
    %c0_4 = arith.constant 0 : index
    %2 = vector.load %arg3[%c0_3, %c0_4] : memref<16x1xi32, #tpu.memory_space<vmem>>, vector<16x1xi32>
    %3 = tpu.iota {dimensions = array<i32: 1>} : vector<16x136xi32>
    %4 = vector.broadcast %0 : vector<16x1xi32> to vector<16x136xi32>
    %5 = arith.cmpi eq, %3, %4 : vector<16x136xi32>
    %c100_i32 = arith.constant 100 : i32
    %6 = vector.broadcast %c100_i32 : i32 to vector<16x1xi32>
    %7 = arith.addi %6, %2 : vector<16x1xi32>
    %8 = vector.broadcast %7 : vector<16x1xi32> to vector<16x136xi32>
    %9 = arith.cmpi eq, %3, %8 : vector<16x136xi32>
    %10 = arith.ori %5, %9 : vector<16x136xi1>
    %c132_i32 = arith.constant 132 : i32
    %11 = vector.broadcast %c132_i32 : i32 to vector<16x1xi32>
    %12 = arith.addi %11, %1 : vector<16x1xi32>
    %13 = vector.broadcast %12 : vector<16x1xi32> to vector<16x136xi32>
    %14 = arith.cmpi eq, %3, %13 : vector<16x136xi32>
    %15 = arith.ori %10, %14 : vector<16x136xi1>
    %16 = arith.extui %15 : vector<16x136xi1> to vector<16x136xi32>
    %17 = arith.sitofp %16 : vector<16x136xi32> to vector<16x136xf32>
    %c0_5 = arith.constant 0 : index
    %c0_6 = arith.constant 0 : index
    %18 = vector.load %arg9[%c0_5, %c0_6] : memref<136x32xf32, #tpu.memory_space<vmem>>, vector<136x32xf32>
    %cst = arith.constant dense<0.000000e+00> : vector<16x32xf32>
    %19 = tpu.matmul %17, %18, %cst {dimension_numbers = #tpu.dot_dimension_numbers<[1], [0], [0], [1], [0, 0, 1, 1], [], []>} : vector<16x136xf32>, vector<136x32xf32>, vector<16x32xf32> -> vector<16x32xf32>
    %c0_7 = arith.constant 0 : index
    %c0_8 = arith.constant 0 : index
    %20 = vector.load %arg10[%c0_7, %c0_8] : memref<1x32xf32, #tpu.memory_space<vmem>>, vector<1x32xf32>
    %c0_9 = arith.constant 0 : index
    %c0_10 = arith.constant 0 : index
    %21 = vector.load %arg11[%c0_9, %c0_10] : memref<1x32xf32, #tpu.memory_space<vmem>>, vector<1x32xf32>
    %cst_11 = arith.constant dense<0.000000e+00> : vector<16xf32>
    %22 = vector.multi_reduction <add>, %19, %cst_11 [1] : vector<16x32xf32> to vector<16xf32>
    %23 = vector.shape_cast %22 : vector<16xf32> to vector<16x1xf32>
    %cst_12 = arith.constant 3.200000e+01 : f32
    %24 = vector.broadcast %cst_12 : f32 to vector<16x1xf32>
    %25 = arith.divf %23, %24 : vector<16x1xf32>
    %26 = vector.broadcast %25 : vector<16x1xf32> to vector<16x32xf32>
    %27 = arith.subf %19, %26 : vector<16x32xf32>
    %28 = arith.mulf %27, %27 : vector<16x32xf32>
    %cst_13 = arith.constant dense<0.000000e+00> : vector<16xf32>
    %29 = vector.multi_reduction <add>, %28, %cst_13 [1] : vector<16x32xf32> to vector<16xf32>
    %30 = vector.shape_cast %29 : vector<16xf32> to vector<16x1xf32>
    %cst_14 = arith.constant 3.200000e+01 : f32
    %31 = vector.broadcast %cst_14 : f32 to vector<16x1xf32>
    %32 = arith.divf %30, %31 : vector<16x1xf32>
    %cst_15 = arith.constant 9.99999996E-13 : f32
    %33 = vector.broadcast %cst_15 : f32 to vector<16x1xf32>
    %34 = arith.addf %32, %33 : vector<16x1xf32>
    %35 = math.rsqrt %34 : vector<16x1xf32>
    %36 = vector.broadcast %35 : vector<16x1xf32> to vector<16x32xf32>
    %37 = arith.mulf %27, %36 : vector<16x32xf32>
    %38 = vector.broadcast %20 : vector<1x32xf32> to vector<16x32xf32>
    %39 = arith.mulf %37, %38 : vector<16x32xf32>
    %40 = vector.broadcast %21 : vector<1x32xf32> to vector<16x32xf32>
    %41 = arith.addf %39, %40 : vector<16x32xf32>
    %c0_16 = arith.constant 0 : index
    %c0_17 = arith.constant 0 : index
    %42 = vector.load %arg4[%c0_16, %c0_17] : memref<16x1xi32, #tpu.memory_space<vmem>>, vector<16x1xi32>
    %c0_18 = arith.constant 0 : index
    %c0_19 = arith.constant 0 : index
    %43 = vector.load %arg5[%c0_18, %c0_19] : memref<1x16xi32, #tpu.memory_space<vmem>>, vector<1x16xi32>
    %44 = vector.broadcast %42 : vector<16x1xi32> to vector<16x16xi32>
    %45 = vector.broadcast %43 : vector<1x16xi32> to vector<16x16xi32>
    %46 = arith.cmpi eq, %44, %45 : vector<16x16xi32>
    %c0_20 = arith.constant 0 : index
    %c0_21 = arith.constant 0 : index
    %47 = vector.load %arg6[%c0_20, %c0_21] : memref<1x16xf32, #tpu.memory_space<vmem>>, vector<1x16xf32>
    %cst_22 = arith.constant 5.000000e-01 : f32
    %48 = vector.broadcast %cst_22 : f32 to vector<1x16xf32>
    %49 = arith.cmpf ogt, %47, %48 : vector<1x16xf32>
    %50 = vector.broadcast %49 : vector<1x16xi1> to vector<16x16xi1>
    %51 = arith.andi %46, %50 : vector<16x16xi1>
    %cst_23 = arith.constant 0.000000e+00 : f32
    %cst_24 = arith.constant -1.000000e+04 : f32
    %52 = vector.broadcast %cst_23 : f32 to vector<16x16xf32>
    %53 = vector.broadcast %cst_24 : f32 to vector<16x16xf32>
    %54 = arith.select %51, %52, %53 : vector<16x16xi1>, vector<16x16xf32>
    %c0_25 = arith.constant 0 : index
    %c0_26 = arith.constant 0 : index
    %c0_27 = arith.constant 0 : index
    %55 = vector.load %arg12[%c0_25, %c0_26, %c0_27] : memref<2x32x96xf32, #tpu.memory_space<vmem>>, vector<1x32x96xf32>
    %56 = vector.shape_cast %55 : vector<1x32x96xf32> to vector<32x96xf32>
    %cst_28 = arith.constant dense<0.000000e+00> : vector<16x96xf32>
    %57 = tpu.matmul %41, %56, %cst_28 {dimension_numbers = #tpu.dot_dimension_numbers<[1], [0], [0], [1], [0, 0, 1, 1], [], []>} : vector<16x32xf32>, vector<32x96xf32>, vector<16x96xf32> -> vector<16x96xf32>
    %c0_29 = arith.constant 0 : index
    %c0_30 = arith.constant 0 : index
    %c0_31 = arith.constant 0 : index
    %58 = vector.load %arg13[%c0_29, %c0_30, %c0_31] : memref<2x1x96xf32, #tpu.memory_space<vmem>>, vector<1x1x96xf32>
    %59 = vector.shape_cast %58 : vector<1x1x96xf32> to vector<1x96xf32>
    %60 = vector.broadcast %59 : vector<1x96xf32> to vector<16x96xf32>
    %61 = arith.addf %57, %60 : vector<16x96xf32>
    %62 = vector.extract_strided_slice %61 {offsets = [0, 0], sizes = [16, 16], strides = [1, 1]} : vector<16x96xf32> to vector<16x16xf32>
    %63 = vector.extract_strided_slice %61 {offsets = [0, 32], sizes = [16, 16], strides = [1, 1]} : vector<16x96xf32> to vector<16x16xf32>
    %64 = vector.extract_strided_slice %61 {offsets = [0, 64], sizes = [16, 16], strides = [1, 1]} : vector<16x96xf32> to vector<16x16xf32>
    %cst_32 = arith.constant dense<0.000000e+00> : vector<16x16xf32>
    %65 = tpu.matmul %62, %63, %cst_32 {dimension_numbers = #tpu.dot_dimension_numbers<[1], [1], [0], [0], [0, 0, 1, 0], [], []>} : vector<16x16xf32>, vector<16x16xf32>, vector<16x16xf32> -> vector<16x16xf32>
    %66 = arith.addf %65, %54 : vector<16x16xf32>
    %cst_33 = arith.constant dense<0xFF800000> : vector<16xf32>
    %67 = vector.multi_reduction <maximumf>, %66, %cst_33 [1] : vector<16x16xf32> to vector<16xf32>
    %68 = vector.shape_cast %67 : vector<16xf32> to vector<16x1xf32>
    %69 = vector.broadcast %68 : vector<16x1xf32> to vector<16x16xf32>
    %70 = arith.subf %66, %69 : vector<16x16xf32>
    %71 = math.exp %70 : vector<16x16xf32>
    %cst_34 = arith.constant dense<0.000000e+00> : vector<16xf32>
    %72 = vector.multi_reduction <add>, %71, %cst_34 [1] : vector<16x16xf32> to vector<16xf32>
    %73 = vector.shape_cast %72 : vector<16xf32> to vector<16x1xf32>
    %74 = tpu.reciprocal %73 {approx = true} : vector<16x1xf32> -> vector<16x1xf32>
    %75 = vector.broadcast %74 : vector<16x1xf32> to vector<16x16xf32>
    %76 = arith.mulf %71, %75 : vector<16x16xf32>
    %cst_35 = arith.constant dense<0.000000e+00> : vector<16x16xf32>
    %77 = tpu.matmul %76, %64, %cst_35 {dimension_numbers = #tpu.dot_dimension_numbers<[1], [0], [0], [1], [0, 0, 1, 1], [], []>} : vector<16x16xf32>, vector<16x16xf32>, vector<16x16xf32> -> vector<16x16xf32>
    %78 = vector.extract_strided_slice %61 {offsets = [0, 16], sizes = [16, 16], strides = [1, 1]} : vector<16x96xf32> to vector<16x16xf32>
    %79 = vector.extract_strided_slice %61 {offsets = [0, 48], sizes = [16, 16], strides = [1, 1]} : vector<16x96xf32> to vector<16x16xf32>
    %80 = vector.extract_strided_slice %61 {offsets = [0, 80], sizes = [16, 16], strides = [1, 1]} : vector<16x96xf32> to vector<16x16xf32>
    %cst_36 = arith.constant dense<0.000000e+00> : vector<16x16xf32>
    %81 = tpu.matmul %78, %79, %cst_36 {dimension_numbers = #tpu.dot_dimension_numbers<[1], [1], [0], [0], [0, 0, 1, 0], [], []>} : vector<16x16xf32>, vector<16x16xf32>, vector<16x16xf32> -> vector<16x16xf32>
    %82 = arith.addf %81, %54 : vector<16x16xf32>
    %cst_37 = arith.constant dense<0xFF800000> : vector<16xf32>
    %83 = vector.multi_reduction <maximumf>, %82, %cst_37 [1] : vector<16x16xf32> to vector<16xf32>
    %84 = vector.shape_cast %83 : vector<16xf32> to vector<16x1xf32>
    %85 = vector.broadcast %84 : vector<16x1xf32> to vector<16x16xf32>
    %86 = arith.subf %82, %85 : vector<16x16xf32>
    %87 = math.exp %86 : vector<16x16xf32>
    %cst_38 = arith.constant dense<0.000000e+00> : vector<16xf32>
    %88 = vector.multi_reduction <add>, %87, %cst_38 [1] : vector<16x16xf32> to vector<16xf32>
    %89 = vector.shape_cast %88 : vector<16xf32> to vector<16x1xf32>
    %90 = tpu.reciprocal %89 {approx = true} : vector<16x1xf32> -> vector<16x1xf32>
    %91 = vector.broadcast %90 : vector<16x1xf32> to vector<16x16xf32>
    %92 = arith.mulf %87, %91 : vector<16x16xf32>
    %cst_39 = arith.constant dense<0.000000e+00> : vector<16x16xf32>
    %93 = tpu.matmul %92, %80, %cst_39 {dimension_numbers = #tpu.dot_dimension_numbers<[1], [0], [0], [1], [0, 0, 1, 1], [], []>} : vector<16x16xf32>, vector<16x16xf32>, vector<16x16xf32> -> vector<16x16xf32>
    %94 = tpu.concatenate %77, %93 in 1 : vector<16x16xf32>, vector<16x16xf32> -> vector<16x32xf32>
    %c0_40 = arith.constant 0 : index
    %c0_41 = arith.constant 0 : index
    %c0_42 = arith.constant 0 : index
    %95 = vector.load %arg14[%c0_40, %c0_41, %c0_42] : memref<2x32x32xf32, #tpu.memory_space<vmem>>, vector<1x32x32xf32>
    %96 = vector.shape_cast %95 : vector<1x32x32xf32> to vector<32x32xf32>
    %cst_43 = arith.constant dense<0.000000e+00> : vector<16x32xf32>
    %97 = tpu.matmul %94, %96, %cst_43 {dimension_numbers = #tpu.dot_dimension_numbers<[1], [0], [0], [1], [0, 0, 1, 1], [], []>} : vector<16x32xf32>, vector<32x32xf32>, vector<16x32xf32> -> vector<16x32xf32>
    %c0_44 = arith.constant 0 : index
    %c0_45 = arith.constant 0 : index
    %c0_46 = arith.constant 0 : index
    %98 = vector.load %arg15[%c0_44, %c0_45, %c0_46] : memref<2x1x32xf32, #tpu.memory_space<vmem>>, vector<1x1x32xf32>
    %99 = vector.shape_cast %98 : vector<1x1x32xf32> to vector<1x32xf32>
    %100 = vector.broadcast %99 : vector<1x32xf32> to vector<16x32xf32>
    %101 = arith.addf %97, %100 : vector<16x32xf32>
    %102 = arith.addf %41, %101 : vector<16x32xf32>
    %c0_47 = arith.constant 0 : index
    %c0_48 = arith.constant 0 : index
    %c0_49 = arith.constant 0 : index
    %103 = vector.load %arg16[%c0_47, %c0_48, %c0_49] : memref<2x1x32xf32, #tpu.memory_space<vmem>>, vector<1x1x32xf32>
    %104 = vector.shape_cast %103 : vector<1x1x32xf32> to vector<1x32xf32>
    %c0_50 = arith.constant 0 : index
    %c0_51 = arith.constant 0 : index
    %c0_52 = arith.constant 0 : index
    %105 = vector.load %arg17[%c0_50, %c0_51, %c0_52] : memref<2x1x32xf32, #tpu.memory_space<vmem>>, vector<1x1x32xf32>
    %106 = vector.shape_cast %105 : vector<1x1x32xf32> to vector<1x32xf32>
    %cst_53 = arith.constant dense<0.000000e+00> : vector<16xf32>
    %107 = vector.multi_reduction <add>, %102, %cst_53 [1] : vector<16x32xf32> to vector<16xf32>
    %108 = vector.shape_cast %107 : vector<16xf32> to vector<16x1xf32>
    %cst_54 = arith.constant 3.200000e+01 : f32
    %109 = vector.broadcast %cst_54 : f32 to vector<16x1xf32>
    %110 = arith.divf %108, %109 : vector<16x1xf32>
    %111 = vector.broadcast %110 : vector<16x1xf32> to vector<16x32xf32>
    %112 = arith.subf %102, %111 : vector<16x32xf32>
    %113 = arith.mulf %112, %112 : vector<16x32xf32>
    %cst_55 = arith.constant dense<0.000000e+00> : vector<16xf32>
    %114 = vector.multi_reduction <add>, %113, %cst_55 [1] : vector<16x32xf32> to vector<16xf32>
    %115 = vector.shape_cast %114 : vector<16xf32> to vector<16x1xf32>
    %cst_56 = arith.constant 3.200000e+01 : f32
    %116 = vector.broadcast %cst_56 : f32 to vector<16x1xf32>
    %117 = arith.divf %115, %116 : vector<16x1xf32>
    %cst_57 = arith.constant 9.99999996E-13 : f32
    %118 = vector.broadcast %cst_57 : f32 to vector<16x1xf32>
    %119 = arith.addf %117, %118 : vector<16x1xf32>
    %120 = math.rsqrt %119 : vector<16x1xf32>
    %121 = vector.broadcast %120 : vector<16x1xf32> to vector<16x32xf32>
    %122 = arith.mulf %112, %121 : vector<16x32xf32>
    %123 = vector.broadcast %104 : vector<1x32xf32> to vector<16x32xf32>
    %124 = arith.mulf %122, %123 : vector<16x32xf32>
    %125 = vector.broadcast %106 : vector<1x32xf32> to vector<16x32xf32>
    %126 = arith.addf %124, %125 : vector<16x32xf32>
    %c0_58 = arith.constant 0 : index
    %c0_59 = arith.constant 0 : index
    %c0_60 = arith.constant 0 : index
    %127 = vector.load %arg18[%c0_58, %c0_59, %c0_60] : memref<2x32x64xf32, #tpu.memory_space<vmem>>, vector<1x32x64xf32>
    %128 = vector.shape_cast %127 : vector<1x32x64xf32> to vector<32x64xf32>
    %cst_61 = arith.constant dense<0.000000e+00> : vector<16x64xf32>
    %129 = tpu.matmul %126, %128, %cst_61 {dimension_numbers = #tpu.dot_dimension_numbers<[1], [0], [0], [1], [0, 0, 1, 1], [], []>} : vector<16x32xf32>, vector<32x64xf32>, vector<16x64xf32> -> vector<16x64xf32>
    %c0_62 = arith.constant 0 : index
    %c0_63 = arith.constant 0 : index
    %c0_64 = arith.constant 0 : index
    %130 = vector.load %arg19[%c0_62, %c0_63, %c0_64] : memref<2x1x64xf32, #tpu.memory_space<vmem>>, vector<1x1x64xf32>
    %131 = vector.shape_cast %130 : vector<1x1x64xf32> to vector<1x64xf32>
    %132 = vector.broadcast %131 : vector<1x64xf32> to vector<16x64xf32>
    %133 = arith.addf %129, %132 : vector<16x64xf32>
    %134 = arith.mulf %133, %133 : vector<16x64xf32>
    %135 = arith.mulf %133, %134 : vector<16x64xf32>
    %cst_65 = arith.constant 4.471500e-02 : f32
    %136 = vector.broadcast %cst_65 : f32 to vector<16x64xf32>
    %137 = arith.mulf %136, %135 : vector<16x64xf32>
    %138 = arith.addf %133, %137 : vector<16x64xf32>
    %cst_66 = arith.constant 0.797884583 : f32
    %139 = vector.broadcast %cst_66 : f32 to vector<16x64xf32>
    %140 = arith.mulf %139, %138 : vector<16x64xf32>
    %141 = math.tanh %140 : vector<16x64xf32>
    %cst_67 = arith.constant 1.000000e+00 : f32
    %142 = vector.broadcast %cst_67 : f32 to vector<16x64xf32>
    %143 = arith.addf %142, %141 : vector<16x64xf32>
    %cst_68 = arith.constant 5.000000e-01 : f32
    %144 = vector.broadcast %cst_68 : f32 to vector<16x64xf32>
    %145 = arith.mulf %144, %143 : vector<16x64xf32>
    %146 = arith.mulf %133, %145 : vector<16x64xf32>
    %c0_69 = arith.constant 0 : index
    %c0_70 = arith.constant 0 : index
    %c0_71 = arith.constant 0 : index
    %147 = vector.load %arg20[%c0_69, %c0_70, %c0_71] : memref<2x64x32xf32, #tpu.memory_space<vmem>>, vector<1x64x32xf32>
    %148 = vector.shape_cast %147 : vector<1x64x32xf32> to vector<64x32xf32>
    %cst_72 = arith.constant dense<0.000000e+00> : vector<16x32xf32>
    %149 = tpu.matmul %146, %148, %cst_72 {dimension_numbers = #tpu.dot_dimension_numbers<[1], [0], [0], [1], [0, 0, 1, 1], [], []>} : vector<16x64xf32>, vector<64x32xf32>, vector<16x32xf32> -> vector<16x32xf32>
    %c0_73 = arith.constant 0 : index
    %c0_74 = arith.constant 0 : index
    %c0_75 = arith.constant 0 : index
    %150 = vector.load %arg21[%c0_73, %c0_74, %c0_75] : memref<2x1x32xf32, #tpu.memory_space<vmem>>, vector<1x1x32xf32>
    %151 = vector.shape_cast %150 : vector<1x1x32xf32> to vector<1x32xf32>
    %152 = vector.broadcast %151 : vector<1x32xf32> to vector<16x32xf32>
    %153 = arith.addf %149, %152 : vector<16x32xf32>
    %154 = arith.addf %126, %153 : vector<16x32xf32>
    %c0_76 = arith.constant 0 : index
    %c0_77 = arith.constant 0 : index
    %c0_78 = arith.constant 0 : index
    %155 = vector.load %arg22[%c0_76, %c0_77, %c0_78] : memref<2x1x32xf32, #tpu.memory_space<vmem>>, vector<1x1x32xf32>
    %156 = vector.shape_cast %155 : vector<1x1x32xf32> to vector<1x32xf32>
    %c0_79 = arith.constant 0 : index
    %c0_80 = arith.constant 0 : index
    %c0_81 = arith.constant 0 : index
    %157 = vector.load %arg23[%c0_79, %c0_80, %c0_81] : memref<2x1x32xf32, #tpu.memory_space<vmem>>, vector<1x1x32xf32>
    %158 = vector.shape_cast %157 : vector<1x1x32xf32> to vector<1x32xf32>
    %cst_82 = arith.constant dense<0.000000e+00> : vector<16xf32>
    %159 = vector.multi_reduction <add>, %154, %cst_82 [1] : vector<16x32xf32> to vector<16xf32>
    %160 = vector.shape_cast %159 : vector<16xf32> to vector<16x1xf32>
    %cst_83 = arith.constant 3.200000e+01 : f32
    %161 = vector.broadcast %cst_83 : f32 to vector<16x1xf32>
    %162 = arith.divf %160, %161 : vector<16x1xf32>
    %163 = vector.broadcast %162 : vector<16x1xf32> to vector<16x32xf32>
    %164 = arith.subf %154, %163 : vector<16x32xf32>
    %165 = arith.mulf %164, %164 : vector<16x32xf32>
    %cst_84 = arith.constant dense<0.000000e+00> : vector<16xf32>
    %166 = vector.multi_reduction <add>, %165, %cst_84 [1] : vector<16x32xf32> to vector<16xf32>
    %167 = vector.shape_cast %166 : vector<16xf32> to vector<16x1xf32>
    %cst_85 = arith.constant 3.200000e+01 : f32
    %168 = vector.broadcast %cst_85 : f32 to vector<16x1xf32>
    %169 = arith.divf %167, %168 : vector<16x1xf32>
    %cst_86 = arith.constant 9.99999996E-13 : f32
    %170 = vector.broadcast %cst_86 : f32 to vector<16x1xf32>
    %171 = arith.addf %169, %170 : vector<16x1xf32>
    %172 = math.rsqrt %171 : vector<16x1xf32>
    %173 = vector.broadcast %172 : vector<16x1xf32> to vector<16x32xf32>
    %174 = arith.mulf %164, %173 : vector<16x32xf32>
    %175 = vector.broadcast %156 : vector<1x32xf32> to vector<16x32xf32>
    %176 = arith.mulf %174, %175 : vector<16x32xf32>
    %177 = vector.broadcast %158 : vector<1x32xf32> to vector<16x32xf32>
    %178 = arith.addf %176, %177 : vector<16x32xf32>
    %c1 = arith.constant 1 : index
    %c0_87 = arith.constant 0 : index
    %c0_88 = arith.constant 0 : index
    %179 = vector.load %arg12[%c1, %c0_87, %c0_88] : memref<2x32x96xf32, #tpu.memory_space<vmem>>, vector<1x32x96xf32>
    %180 = vector.shape_cast %179 : vector<1x32x96xf32> to vector<32x96xf32>
    %cst_89 = arith.constant dense<0.000000e+00> : vector<16x96xf32>
    %181 = tpu.matmul %178, %180, %cst_89 {dimension_numbers = #tpu.dot_dimension_numbers<[1], [0], [0], [1], [0, 0, 1, 1], [], []>} : vector<16x32xf32>, vector<32x96xf32>, vector<16x96xf32> -> vector<16x96xf32>
    %c1_90 = arith.constant 1 : index
    %c0_91 = arith.constant 0 : index
    %c0_92 = arith.constant 0 : index
    %182 = vector.load %arg13[%c1_90, %c0_91, %c0_92] : memref<2x1x96xf32, #tpu.memory_space<vmem>>, vector<1x1x96xf32>
    %183 = vector.shape_cast %182 : vector<1x1x96xf32> to vector<1x96xf32>
    %184 = vector.broadcast %183 : vector<1x96xf32> to vector<16x96xf32>
    %185 = arith.addf %181, %184 : vector<16x96xf32>
    %186 = vector.extract_strided_slice %185 {offsets = [0, 0], sizes = [16, 16], strides = [1, 1]} : vector<16x96xf32> to vector<16x16xf32>
    %187 = vector.extract_strided_slice %185 {offsets = [0, 32], sizes = [16, 16], strides = [1, 1]} : vector<16x96xf32> to vector<16x16xf32>
    %188 = vector.extract_strided_slice %185 {offsets = [0, 64], sizes = [16, 16], strides = [1, 1]} : vector<16x96xf32> to vector<16x16xf32>
    %cst_93 = arith.constant dense<0.000000e+00> : vector<16x16xf32>
    %189 = tpu.matmul %186, %187, %cst_93 {dimension_numbers = #tpu.dot_dimension_numbers<[1], [1], [0], [0], [0, 0, 1, 0], [], []>} : vector<16x16xf32>, vector<16x16xf32>, vector<16x16xf32> -> vector<16x16xf32>
    %190 = arith.addf %189, %54 : vector<16x16xf32>
    %cst_94 = arith.constant dense<0xFF800000> : vector<16xf32>
    %191 = vector.multi_reduction <maximumf>, %190, %cst_94 [1] : vector<16x16xf32> to vector<16xf32>
    %192 = vector.shape_cast %191 : vector<16xf32> to vector<16x1xf32>
    %193 = vector.broadcast %192 : vector<16x1xf32> to vector<16x16xf32>
    %194 = arith.subf %190, %193 : vector<16x16xf32>
    %195 = math.exp %194 : vector<16x16xf32>
    %cst_95 = arith.constant dense<0.000000e+00> : vector<16xf32>
    %196 = vector.multi_reduction <add>, %195, %cst_95 [1] : vector<16x16xf32> to vector<16xf32>
    %197 = vector.shape_cast %196 : vector<16xf32> to vector<16x1xf32>
    %198 = tpu.reciprocal %197 {approx = true} : vector<16x1xf32> -> vector<16x1xf32>
    %199 = vector.broadcast %198 : vector<16x1xf32> to vector<16x16xf32>
    %200 = arith.mulf %195, %199 : vector<16x16xf32>
    %cst_96 = arith.constant dense<0.000000e+00> : vector<16x16xf32>
    %201 = tpu.matmul %200, %188, %cst_96 {dimension_numbers = #tpu.dot_dimension_numbers<[1], [0], [0], [1], [0, 0, 1, 1], [], []>} : vector<16x16xf32>, vector<16x16xf32>, vector<16x16xf32> -> vector<16x16xf32>
    %202 = vector.extract_strided_slice %185 {offsets = [0, 16], sizes = [16, 16], strides = [1, 1]} : vector<16x96xf32> to vector<16x16xf32>
    %203 = vector.extract_strided_slice %185 {offsets = [0, 48], sizes = [16, 16], strides = [1, 1]} : vector<16x96xf32> to vector<16x16xf32>
    %204 = vector.extract_strided_slice %185 {offsets = [0, 80], sizes = [16, 16], strides = [1, 1]} : vector<16x96xf32> to vector<16x16xf32>
    %cst_97 = arith.constant dense<0.000000e+00> : vector<16x16xf32>
    %205 = tpu.matmul %202, %203, %cst_97 {dimension_numbers = #tpu.dot_dimension_numbers<[1], [1], [0], [0], [0, 0, 1, 0], [], []>} : vector<16x16xf32>, vector<16x16xf32>, vector<16x16xf32> -> vector<16x16xf32>
    %206 = arith.addf %205, %54 : vector<16x16xf32>
    %cst_98 = arith.constant dense<0xFF800000> : vector<16xf32>
    %207 = vector.multi_reduction <maximumf>, %206, %cst_98 [1] : vector<16x16xf32> to vector<16xf32>
    %208 = vector.shape_cast %207 : vector<16xf32> to vector<16x1xf32>
    %209 = vector.broadcast %208 : vector<16x1xf32> to vector<16x16xf32>
    %210 = arith.subf %206, %209 : vector<16x16xf32>
    %211 = math.exp %210 : vector<16x16xf32>
    %cst_99 = arith.constant dense<0.000000e+00> : vector<16xf32>
    %212 = vector.multi_reduction <add>, %211, %cst_99 [1] : vector<16x16xf32> to vector<16xf32>
    %213 = vector.shape_cast %212 : vector<16xf32> to vector<16x1xf32>
    %214 = tpu.reciprocal %213 {approx = true} : vector<16x1xf32> -> vector<16x1xf32>
    %215 = vector.broadcast %214 : vector<16x1xf32> to vector<16x16xf32>
    %216 = arith.mulf %211, %215 : vector<16x16xf32>
    %cst_100 = arith.constant dense<0.000000e+00> : vector<16x16xf32>
    %217 = tpu.matmul %216, %204, %cst_100 {dimension_numbers = #tpu.dot_dimension_numbers<[1], [0], [0], [1], [0, 0, 1, 1], [], []>} : vector<16x16xf32>, vector<16x16xf32>, vector<16x16xf32> -> vector<16x16xf32>
    %218 = tpu.concatenate %201, %217 in 1 : vector<16x16xf32>, vector<16x16xf32> -> vector<16x32xf32>
    %c1_101 = arith.constant 1 : index
    %c0_102 = arith.constant 0 : index
    %c0_103 = arith.constant 0 : index
    %219 = vector.load %arg14[%c1_101, %c0_102, %c0_103] : memref<2x32x32xf32, #tpu.memory_space<vmem>>, vector<1x32x32xf32>
    %220 = vector.shape_cast %219 : vector<1x32x32xf32> to vector<32x32xf32>
    %cst_104 = arith.constant dense<0.000000e+00> : vector<16x32xf32>
    %221 = tpu.matmul %218, %220, %cst_104 {dimension_numbers = #tpu.dot_dimension_numbers<[1], [0], [0], [1], [0, 0, 1, 1], [], []>} : vector<16x32xf32>, vector<32x32xf32>, vector<16x32xf32> -> vector<16x32xf32>
    %c1_105 = arith.constant 1 : index
    %c0_106 = arith.constant 0 : index
    %c0_107 = arith.constant 0 : index
    %222 = vector.load %arg15[%c1_105, %c0_106, %c0_107] : memref<2x1x32xf32, #tpu.memory_space<vmem>>, vector<1x1x32xf32>
    %223 = vector.shape_cast %222 : vector<1x1x32xf32> to vector<1x32xf32>
    %224 = vector.broadcast %223 : vector<1x32xf32> to vector<16x32xf32>
    %225 = arith.addf %221, %224 : vector<16x32xf32>
    %226 = arith.addf %178, %225 : vector<16x32xf32>
    %c1_108 = arith.constant 1 : index
    %c0_109 = arith.constant 0 : index
    %c0_110 = arith.constant 0 : index
    %227 = vector.load %arg16[%c1_108, %c0_109, %c0_110] : memref<2x1x32xf32, #tpu.memory_space<vmem>>, vector<1x1x32xf32>
    %228 = vector.shape_cast %227 : vector<1x1x32xf32> to vector<1x32xf32>
    %c1_111 = arith.constant 1 : index
    %c0_112 = arith.constant 0 : index
    %c0_113 = arith.constant 0 : index
    %229 = vector.load %arg17[%c1_111, %c0_112, %c0_113] : memref<2x1x32xf32, #tpu.memory_space<vmem>>, vector<1x1x32xf32>
    %230 = vector.shape_cast %229 : vector<1x1x32xf32> to vector<1x32xf32>
    %cst_114 = arith.constant dense<0.000000e+00> : vector<16xf32>
    %231 = vector.multi_reduction <add>, %226, %cst_114 [1] : vector<16x32xf32> to vector<16xf32>
    %232 = vector.shape_cast %231 : vector<16xf32> to vector<16x1xf32>
    %cst_115 = arith.constant 3.200000e+01 : f32
    %233 = vector.broadcast %cst_115 : f32 to vector<16x1xf32>
    %234 = arith.divf %232, %233 : vector<16x1xf32>
    %235 = vector.broadcast %234 : vector<16x1xf32> to vector<16x32xf32>
    %236 = arith.subf %226, %235 : vector<16x32xf32>
    %237 = arith.mulf %236, %236 : vector<16x32xf32>
    %cst_116 = arith.constant dense<0.000000e+00> : vector<16xf32>
    %238 = vector.multi_reduction <add>, %237, %cst_116 [1] : vector<16x32xf32> to vector<16xf32>
    %239 = vector.shape_cast %238 : vector<16xf32> to vector<16x1xf32>
    %cst_117 = arith.constant 3.200000e+01 : f32
    %240 = vector.broadcast %cst_117 : f32 to vector<16x1xf32>
    %241 = arith.divf %239, %240 : vector<16x1xf32>
    %cst_118 = arith.constant 9.99999996E-13 : f32
    %242 = vector.broadcast %cst_118 : f32 to vector<16x1xf32>
    %243 = arith.addf %241, %242 : vector<16x1xf32>
    %244 = math.rsqrt %243 : vector<16x1xf32>
    %245 = vector.broadcast %244 : vector<16x1xf32> to vector<16x32xf32>
    %246 = arith.mulf %236, %245 : vector<16x32xf32>
    %247 = vector.broadcast %228 : vector<1x32xf32> to vector<16x32xf32>
    %248 = arith.mulf %246, %247 : vector<16x32xf32>
    %249 = vector.broadcast %230 : vector<1x32xf32> to vector<16x32xf32>
    %250 = arith.addf %248, %249 : vector<16x32xf32>
    %c1_119 = arith.constant 1 : index
    %c0_120 = arith.constant 0 : index
    %c0_121 = arith.constant 0 : index
    %251 = vector.load %arg18[%c1_119, %c0_120, %c0_121] : memref<2x32x64xf32, #tpu.memory_space<vmem>>, vector<1x32x64xf32>
    %252 = vector.shape_cast %251 : vector<1x32x64xf32> to vector<32x64xf32>
    %cst_122 = arith.constant dense<0.000000e+00> : vector<16x64xf32>
    %253 = tpu.matmul %250, %252, %cst_122 {dimension_numbers = #tpu.dot_dimension_numbers<[1], [0], [0], [1], [0, 0, 1, 1], [], []>} : vector<16x32xf32>, vector<32x64xf32>, vector<16x64xf32> -> vector<16x64xf32>
    %c1_123 = arith.constant 1 : index
    %c0_124 = arith.constant 0 : index
    %c0_125 = arith.constant 0 : index
    %254 = vector.load %arg19[%c1_123, %c0_124, %c0_125] : memref<2x1x64xf32, #tpu.memory_space<vmem>>, vector<1x1x64xf32>
    %255 = vector.shape_cast %254 : vector<1x1x64xf32> to vector<1x64xf32>
    %256 = vector.broadcast %255 : vector<1x64xf32> to vector<16x64xf32>
    %257 = arith.addf %253, %256 : vector<16x64xf32>
    %258 = arith.mulf %257, %257 : vector<16x64xf32>
    %259 = arith.mulf %257, %258 : vector<16x64xf32>
    %cst_126 = arith.constant 4.471500e-02 : f32
    %260 = vector.broadcast %cst_126 : f32 to vector<16x64xf32>
    %261 = arith.mulf %260, %259 : vector<16x64xf32>
    %262 = arith.addf %257, %261 : vector<16x64xf32>
    %cst_127 = arith.constant 0.797884583 : f32
    %263 = vector.broadcast %cst_127 : f32 to vector<16x64xf32>
    %264 = arith.mulf %263, %262 : vector<16x64xf32>
    %265 = math.tanh %264 : vector<16x64xf32>
    %cst_128 = arith.constant 1.000000e+00 : f32
    %266 = vector.broadcast %cst_128 : f32 to vector<16x64xf32>
    %267 = arith.addf %266, %265 : vector<16x64xf32>
    %cst_129 = arith.constant 5.000000e-01 : f32
    %268 = vector.broadcast %cst_129 : f32 to vector<16x64xf32>
    %269 = arith.mulf %268, %267 : vector<16x64xf32>
    %270 = arith.mulf %257, %269 : vector<16x64xf32>
    %c1_130 = arith.constant 1 : index
    %c0_131 = arith.constant 0 : index
    %c0_132 = arith.constant 0 : index
    %271 = vector.load %arg20[%c1_130, %c0_131, %c0_132] : memref<2x64x32xf32, #tpu.memory_space<vmem>>, vector<1x64x32xf32>
    %272 = vector.shape_cast %271 : vector<1x64x32xf32> to vector<64x32xf32>
    %cst_133 = arith.constant dense<0.000000e+00> : vector<16x32xf32>
    %273 = tpu.matmul %270, %272, %cst_133 {dimension_numbers = #tpu.dot_dimension_numbers<[1], [0], [0], [1], [0, 0, 1, 1], [], []>} : vector<16x64xf32>, vector<64x32xf32>, vector<16x32xf32> -> vector<16x32xf32>
    %c1_134 = arith.constant 1 : index
    %c0_135 = arith.constant 0 : index
    %c0_136 = arith.constant 0 : index
    %274 = vector.load %arg21[%c1_134, %c0_135, %c0_136] : memref<2x1x32xf32, #tpu.memory_space<vmem>>, vector<1x1x32xf32>
    %275 = vector.shape_cast %274 : vector<1x1x32xf32> to vector<1x32xf32>
    %276 = vector.broadcast %275 : vector<1x32xf32> to vector<16x32xf32>
    %277 = arith.addf %273, %276 : vector<16x32xf32>
    %278 = arith.addf %250, %277 : vector<16x32xf32>
    %c1_137 = arith.constant 1 : index
    %c0_138 = arith.constant 0 : index
    %c0_139 = arith.constant 0 : index
    %279 = vector.load %arg22[%c1_137, %c0_138, %c0_139] : memref<2x1x32xf32, #tpu.memory_space<vmem>>, vector<1x1x32xf32>
    %280 = vector.shape_cast %279 : vector<1x1x32xf32> to vector<1x32xf32>
    %c1_140 = arith.constant 1 : index
    %c0_141 = arith.constant 0 : index
    %c0_142 = arith.constant 0 : index
    %281 = vector.load %arg23[%c1_140, %c0_141, %c0_142] : memref<2x1x32xf32, #tpu.memory_space<vmem>>, vector<1x1x32xf32>
    %282 = vector.shape_cast %281 : vector<1x1x32xf32> to vector<1x32xf32>
    %cst_143 = arith.constant dense<0.000000e+00> : vector<16xf32>
    %283 = vector.multi_reduction <add>, %278, %cst_143 [1] : vector<16x32xf32> to vector<16xf32>
    %284 = vector.shape_cast %283 : vector<16xf32> to vector<16x1xf32>
    %cst_144 = arith.constant 3.200000e+01 : f32
    %285 = vector.broadcast %cst_144 : f32 to vector<16x1xf32>
    %286 = arith.divf %284, %285 : vector<16x1xf32>
    %287 = vector.broadcast %286 : vector<16x1xf32> to vector<16x32xf32>
    %288 = arith.subf %278, %287 : vector<16x32xf32>
    %289 = arith.mulf %288, %288 : vector<16x32xf32>
    %cst_145 = arith.constant dense<0.000000e+00> : vector<16xf32>
    %290 = vector.multi_reduction <add>, %289, %cst_145 [1] : vector<16x32xf32> to vector<16xf32>
    %291 = vector.shape_cast %290 : vector<16xf32> to vector<16x1xf32>
    %cst_146 = arith.constant 3.200000e+01 : f32
    %292 = vector.broadcast %cst_146 : f32 to vector<16x1xf32>
    %293 = arith.divf %291, %292 : vector<16x1xf32>
    %cst_147 = arith.constant 9.99999996E-13 : f32
    %294 = vector.broadcast %cst_147 : f32 to vector<16x1xf32>
    %295 = arith.addf %293, %294 : vector<16x1xf32>
    %296 = math.rsqrt %295 : vector<16x1xf32>
    %297 = vector.broadcast %296 : vector<16x1xf32> to vector<16x32xf32>
    %298 = arith.mulf %288, %297 : vector<16x32xf32>
    %299 = vector.broadcast %280 : vector<1x32xf32> to vector<16x32xf32>
    %300 = arith.mulf %298, %299 : vector<16x32xf32>
    %301 = vector.broadcast %282 : vector<1x32xf32> to vector<16x32xf32>
    %302 = arith.addf %300, %301 : vector<16x32xf32>
    %c0_148 = arith.constant 0 : index
    %c0_149 = arith.constant 0 : index
    %303 = vector.load %arg26[%c0_148, %c0_149] : memref<16x32xf32, #tpu.memory_space<vmem>>, vector<16x32xf32>
    tpu.vector_store %arg26[%c0_148, %c0_149], %302 {strides = array<i32>} : memref<16x32xf32, #tpu.memory_space<vmem>>, vector<16x32xf32>,
    %c0_150 = arith.constant 0 : index
    %c0_151 = arith.constant 0 : index
    %304 = vector.load %arg24[%c0_150, %c0_151] : memref<32x128xf32, #tpu.memory_space<vmem>>, vector<32x128xf32>
    %cst_152 = arith.constant dense<0.000000e+00> : vector<16x128xf32>
    %305 = tpu.matmul %302, %304, %cst_152 {dimension_numbers = #tpu.dot_dimension_numbers<[1], [0], [0], [1], [0, 0, 1, 1], [], []>} : vector<16x32xf32>, vector<32x128xf32>, vector<16x128xf32> -> vector<16x128xf32>
    %c0_153 = arith.constant 0 : index
    %c0_154 = arith.constant 0 : index
    %306 = vector.load %arg25[%c0_153, %c0_154] : memref<1x128xf32, #tpu.memory_space<vmem>>, vector<1x128xf32>
    %307 = vector.broadcast %306 : vector<1x128xf32> to vector<16x128xf32>
    %308 = arith.addf %305, %307 : vector<16x128xf32>
    %c0_155 = arith.constant 0 : index
    %c0_156 = arith.constant 0 : index
    %309 = vector.load %arg27[%c0_155, %c0_156] : memref<16x128xf32, #tpu.memory_space<vmem>>, vector<16x128xf32>
    tpu.vector_store %arg27[%c0_155, %c0_156], %308 {strides = array<i32>} : memref<16x128xf32, #tpu.memory_space<vmem>>, vector<16x128xf32>,
    %c0_157 = arith.constant 0 : index
    %c0_158 = arith.constant 0 : index
    %310 = vector.load %arg7[%c0_157, %c0_158] : memref<16x1xi32, #tpu.memory_space<vmem>>, vector<16x1xi32>
    %c0_159 = arith.constant 0 : index
    %c0_160 = arith.constant 0 : index
    %311 = vector.load %arg8[%c0_159, %c0_160] : memref<16x1xi32, #tpu.memory_space<vmem>>, vector<16x1xi32>
    %c1_i32 = arith.constant 1 : i32
    %312 = vector.broadcast %c1_i32 : i32 to vector<16x1xi32>
    %313 = arith.cmpi eq, %311, %312 : vector<16x1xi32>
    %c-100_i32 = arith.constant -100 : i32
    %314 = vector.broadcast %c-100_i32 : i32 to vector<16x1xi32>
    %315 = arith.select %313, %310, %314 : vector<16x1xi1>, vector<16x1xi32>
    %cst_161 = arith.constant dense<0xFF800000> : vector<16xf32>
    %316 = vector.multi_reduction <maximumf>, %308, %cst_161 [1] : vector<16x128xf32> to vector<16xf32>
    %317 = vector.shape_cast %316 : vector<16xf32> to vector<16x1xf32>
    %318 = vector.broadcast %317 : vector<16x1xf32> to vector<16x128xf32>
    %319 = arith.subf %308, %318 : vector<16x128xf32>
    %320 = math.exp %319 : vector<16x128xf32>
    %cst_162 = arith.constant dense<0.000000e+00> : vector<16xf32>
    %321 = vector.multi_reduction <add>, %320, %cst_162 [1] : vector<16x128xf32> to vector<16xf32>
    %322 = vector.shape_cast %321 : vector<16xf32> to vector<16x1xf32>
    %323 = math.log %322 : vector<16x1xf32>
    %324 = vector.broadcast %323 : vector<16x1xf32> to vector<16x128xf32>
    %325 = arith.subf %319, %324 : vector<16x128xf32>
    %326 = tpu.iota {dimensions = array<i32: 1>} : vector<16x128xi32>
    %327 = vector.broadcast %315 : vector<16x1xi32> to vector<16x128xi32>
    %328 = arith.cmpi eq, %326, %327 : vector<16x128xi32>
    %329 = arith.extui %328 : vector<16x128xi1> to vector<16x128xi32>
    %330 = arith.sitofp %329 : vector<16x128xi32> to vector<16x128xf32>
    %331 = arith.mulf %330, %325 : vector<16x128xf32>
    %cst_163 = arith.constant dense<0.000000e+00> : vector<16xf32>
    %332 = vector.multi_reduction <add>, %331, %cst_163 [1] : vector<16x128xf32> to vector<16xf32>
    %333 = vector.shape_cast %332 : vector<16xf32> to vector<16x1xf32>
    %cst_164 = arith.constant 0.000000e+00 : f32
    %334 = vector.broadcast %cst_164 : f32 to vector<16x1xf32>
    %335 = arith.subf %334, %333 : vector<16x1xf32>
    %c-100_i32_165 = arith.constant -100 : i32
    %336 = vector.broadcast %c-100_i32_165 : i32 to vector<16x1xi32>
    %337 = arith.cmpi ne, %315, %336 : vector<16x1xi32>
    %338 = arith.extui %337 : vector<16x1xi1> to vector<16x1xi32>
    %339 = arith.sitofp %338 : vector<16x1xi32> to vector<16x1xf32>
    %340 = arith.mulf %335, %339 : vector<16x1xf32>
    %c0_166 = arith.constant 0 : index
    %c0_167 = arith.constant 0 : index
    %341 = vector.load %arg29[%c0_166, %c0_167] : memref<16x1xf32, #tpu.memory_space<vmem>>, vector<16x1xf32>
    tpu.vector_store %arg29[%c0_166, %c0_167], %340 {strides = array<i32>} : memref<16x1xf32, #tpu.memory_space<vmem>>, vector<16x1xf32>,
    %342 = vector.shape_cast %339 : vector<16x1xf32> to vector<1x16x1xf32>
    %cst_168 = arith.constant dense<0.000000e+00> : vector<1xf32>
    %343 = vector.multi_reduction <add>, %342, %cst_168 [1, 2] : vector<1x16x1xf32> to vector<1xf32>
    %344 = vector.shape_cast %343 : vector<1xf32> to vector<1x1x1xf32>
    %345 = vector.extract %344[0, 0, 0] : f32 from vector<1x1x1xf32>
    %346 = vector.shape_cast %340 : vector<16x1xf32> to vector<1x16x1xf32>
    %cst_169 = arith.constant dense<0.000000e+00> : vector<1xf32>
    %347 = vector.multi_reduction <add>, %346, %cst_169 [1, 2] : vector<1x16x1xf32> to vector<1xf32>
    %348 = vector.shape_cast %347 : vector<1xf32> to vector<1x1x1xf32>
    %349 = vector.extract %348[0, 0, 0] : f32 from vector<1x1x1xf32>
    %cst_170 = arith.constant 1.000000e+00 : f32
    %350 = arith.maximumf %345, %cst_170 : f32
    %351 = arith.divf %349, %350 : f32
    %352 = vector.broadcast %351 : f32 to vector<1x1xf32>
    %c0_171 = arith.constant 0 : index
    %c0_172 = arith.constant 0 : index
    %353 = vector.load %arg28[%c0_171, %c0_172] : memref<1x1xf32, #tpu.memory_space<vmem>>, vector<1x1xf32>
    tpu.vector_store %arg28[%c0_171, %c0_172], %352 {strides = array<i32>} : memref<1x1xf32, #tpu.memory_space<vmem>>, vector<1x1xf32>,
    return
  }
  func.func @transform_0(%arg0: i32) -> (i32, i32) {
    %c0_i32 = arith.constant 0 : i32
    %c0_i32_0 = arith.constant 0 : i32
    %c0_i32_1 = arith.constant 0 : i32
    return %c0_i32, %c0_i32_0 : i32, i32
  }
  func.func @transform_1(%arg0: i32) -> (i32, i32) {
    %c0_i32 = arith.constant 0 : i32
    %c0_i32_0 = arith.constant 0 : i32
    %c0_i32_1 = arith.constant 0 : i32
    return %c0_i32, %c0_i32_0 : i32, i32
  }
  func.func @transform_2(%arg0: i32) -> (i32, i32) {
    %c0_i32 = arith.constant 0 : i32
    %c0_i32_0 = arith.constant 0 : i32
    %c0_i32_1 = arith.constant 0 : i32
    return %c0_i32, %c0_i32_0 : i32, i32
  }
  func.func @transform_3(%arg0: i32) -> (i32, i32) {
    %c0_i32 = arith.constant 0 : i32
    %c0_i32_0 = arith.constant 0 : i32
    %c0_i32_1 = arith.constant 0 : i32
    return %c0_i32, %c0_i32_0 : i32, i32
  }
  func.func @transform_4(%arg0: i32) -> (i32, i32) {
    %c0_i32 = arith.constant 0 : i32
    %c0_i32_0 = arith.constant 0 : i32
    %c0_i32_1 = arith.constant 0 : i32
    return %c0_i32, %c0_i32_0 : i32, i32
  }
  func.func @transform_5(%arg0: i32) -> (i32, i32) {
    %c0_i32 = arith.constant 0 : i32
    %c0_i32_0 = arith.constant 0 : i32
    %c0_i32_1 = arith.constant 0 : i32
    return %c0_i32, %c0_i32_0 : i32, i32
  }
  func.func @transform_6(%arg0: i32) -> (i32, i32) {
    %c0_i32 = arith.constant 0 : i32
    %c0_i32_0 = arith.constant 0 : i32
    %c0_i32_1 = arith.constant 0 : i32
    return %c0_i32, %c0_i32_0 : i32, i32
  }
  func.func @transform_7(%arg0: i32) -> (i32, i32) {
    %c0_i32 = arith.constant 0 : i32
    %c0_i32_0 = arith.constant 0 : i32
    %c0_i32_1 = arith.constant 0 : i32
    return %c0_i32, %c0_i32_0 : i32, i32
  }
  func.func @transform_8(%arg0: i32) -> (i32, i32) {
    %c0_i32 = arith.constant 0 : i32
    %c0_i32_0 = arith.constant 0 : i32
    %c0_i32_1 = arith.constant 0 : i32
    return %c0_i32, %c0_i32_0 : i32, i32
  }
  func.func @transform_9(%arg0: i32) -> (i32, i32) {
    %c0_i32 = arith.constant 0 : i32
    %c0_i32_0 = arith.constant 0 : i32
    %c0_i32_1 = arith.constant 0 : i32
    return %c0_i32, %c0_i32_0 : i32, i32
  }
  func.func @transform_10(%arg0: i32) -> (i32, i32) {
    %c0_i32 = arith.constant 0 : i32
    %c0_i32_0 = arith.constant 0 : i32
    %c0_i32_1 = arith.constant 0 : i32
    return %c0_i32, %c0_i32_0 : i32, i32
  }
  func.func @transform_11(%arg0: i32) -> (i32, i32, i32) {
    %c0_i32 = arith.constant 0 : i32
    %c0_i32_0 = arith.constant 0 : i32
    %c0_i32_1 = arith.constant 0 : i32
    %c0_i32_2 = arith.constant 0 : i32
    return %c0_i32, %c0_i32_0, %c0_i32_1 : i32, i32, i32
  }
  func.func @transform_12(%arg0: i32) -> (i32, i32, i32) {
    %c0_i32 = arith.constant 0 : i32
    %c0_i32_0 = arith.constant 0 : i32
    %c0_i32_1 = arith.constant 0 : i32
    %c0_i32_2 = arith.constant 0 : i32
    return %c0_i32, %c0_i32_0, %c0_i32_1 : i32, i32, i32
  }
  func.func @transform_13(%arg0: i32) -> (i32, i32, i32) {
    %c0_i32 = arith.constant 0 : i32
    %c0_i32_0 = arith.constant 0 : i32
    %c0_i32_1 = arith.constant 0 : i32
    %c0_i32_2 = arith.constant 0 : i32
    return %c0_i32, %c0_i32_0, %c0_i32_1 : i32, i32, i32
  }
  func.func @transform_14(%arg0: i32) -> (i32, i32, i32) {
    %c0_i32 = arith.constant 0 : i32
    %c0_i32_0 = arith.constant 0 : i32
    %c0_i32_1 = arith.constant 0 : i32
    %c0_i32_2 = arith.constant 0 : i32
    return %c0_i32, %c0_i32_0, %c0_i32_1 : i32, i32, i32
  }
  func.func @transform_15(%arg0: i32) -> (i32, i32, i32) {
    %c0_i32 = arith.constant 0 : i32
    %c0_i32_0 = arith.constant 0 : i32
    %c0_i32_1 = arith.constant 0 : i32
    %c0_i32_2 = arith.constant 0 : i32
    return %c0_i32, %c0_i32_0, %c0_i32_1 : i32, i32, i32
  }
  func.func @transform_16(%arg0: i32) -> (i32, i32, i32) {
    %c0_i32 = arith.constant 0 : i32
    %c0_i32_0 = arith.constant 0 : i32
    %c0_i32_1 = arith.constant 0 : i32
    %c0_i32_2 = arith.constant 0 : i32
    return %c0_i32, %c0_i32_0, %c0_i32_1 : i32, i32, i32
  }
  func.func @transform_17(%arg0: i32) -> (i32, i32, i32) {
    %c0_i32 = arith.constant 0 : i32
    %c0_i32_0 = arith.constant 0 : i32
    %c0_i32_1 = arith.constant 0 : i32
    %c0_i32_2 = arith.constant 0 : i32
    return %c0_i32, %c0_i32_0, %c0_i32_1 : i32, i32, i32
  }
  func.func @transform_18(%arg0: i32) -> (i32, i32, i32) {
    %c0_i32 = arith.constant 0 : i32
    %c0_i32_0 = arith.constant 0 : i32
    %c0_i32_1 = arith.constant 0 : i32
    %c0_i32_2 = arith.constant 0 : i32
    return %c0_i32, %c0_i32_0, %c0_i32_1 : i32, i32, i32
  }
  func.func @transform_19(%arg0: i32) -> (i32, i32, i32) {
    %c0_i32 = arith.constant 0 : i32
    %c0_i32_0 = arith.constant 0 : i32
    %c0_i32_1 = arith.constant 0 : i32
    %c0_i32_2 = arith.constant 0 : i32
    return %c0_i32, %c0_i32_0, %c0_i32_1 : i32, i32, i32
  }
  func.func @transform_20(%arg0: i32) -> (i32, i32, i32) {
    %c0_i32 = arith.constant 0 : i32
    %c0_i32_0 = arith.constant 0 : i32
    %c0_i32_1 = arith.constant 0 : i32
    %c0_i32_2 = arith.constant 0 : i32
    return %c0_i32, %c0_i32_0, %c0_i32_1 : i32, i32, i32
  }
  func.func @transform_21(%arg0: i32) -> (i32, i32, i32) {
    %c0_i32 = arith.constant 0 : i32
    %c0_i32_0 = arith.constant 0 : i32
    %c0_i32_1 = arith.constant 0 : i32
    %c0_i32_2 = arith.constant 0 : i32
    return %c0_i32, %c0_i32_0, %c0_i32_1 : i32, i32, i32
  }
  func.func @transform_22(%arg0: i32) -> (i32, i32, i32) {
    %c0_i32 = arith.constant 0 : i32
    %c0_i32_0 = arith.constant 0 : i32
    %c0_i32_1 = arith.constant 0 : i32
    %c0_i32_2 = arith.constant 0 : i32
    return %c0_i32, %c0_i32_0, %c0_i32_1 : i32, i32, i32
  }
  func.func @transform_23(%arg0: i32) -> (i32, i32) {
    %c0_i32 = arith.constant 0 : i32
    %c0_i32_0 = arith.constant 0 : i32
    %c0_i32_1 = arith.constant 0 : i32
    return %c0_i32, %c0_i32_0 : i32, i32
  }
  func.func @transform_24(%arg0: i32) -> (i32, i32) {
    %c0_i32 = arith.constant 0 : i32
    %c0_i32_0 = arith.constant 0 : i32
    %c0_i32_1 = arith.constant 0 : i32
    return %c0_i32, %c0_i32_0 : i32, i32
  }
  func.func @transform_25(%arg0: i32) -> (i32, i32) {
    %c0_i32 = arith.constant 0 : i32
    %c0_i32_0 = arith.constant 0 : i32
    %c0_i32_1 = arith.constant 0 : i32
    return %c0_i32, %c0_i32_0 : i32, i32
  }
  func.func @transform_26(%arg0: i32) -> (i32, i32) {
    %c0_i32 = arith.constant 0 : i32
    %c0_i32_0 = arith.constant 0 : i32
    %c0_i32_1 = arith.constant 0 : i32
    return %c0_i32, %c0_i32_0 : i32, i32
  }
  func.func @transform_27(%arg0: i32) -> (i32, i32) {
    %c0_i32 = arith.constant 0 : i32
    %c0_i32_0 = arith.constant 0 : i32
    %c0_i32_1 = arith.constant 0 : i32
    return %c0_i32, %c0_i32_0 : i32, i32
  }
  func.func @transform_28(%arg0: i32) -> (i32, i32) {
    %c0_i32 = arith.constant 0 : i32
    %c0_i32_0 = arith.constant 0 : i32
    %c0_i32_1 = arith.constant 0 : i32
    return %c0_i32, %c0_i32_0 : i32, i32
  }
}

</mosaic_0001>

<bundles_post_ra>
// kernel: tile.0
= control target key start
LH: loop header
LB: loop body
LE: loop exit
PB: predicated region body
PF: predicated region fallthrough
CT: control target
= control target key end

     0   :  { %s66_s8 = smov 125   ;;  %vm7_vm0 = vcmask 7168   ;;  %s67_s11 = smov 126   ;;  %s117_s0 = inlined_call_operand.vmem [shape: s32[2,8], index: 0, kind: input, shape index: {}]   ;;  %s118_s1 = inlined_call_operand.vmem [shape: s32[16,1], index: 1, kind: output, shape index: {}]  }
   0x1   :  { %v4_v0 = vld [vmem:[%s117_s0] sm:$0x3]  ;;  %s65_s0 = smov 127   ;;  %s68_s12 = smov 124  }
   0x2   :  { %5 = vst [vmem:[#allocation0] sm:$0x3] %v4_v0  ;;  %s69_s13 = smov 123   ;;  %s70_s14 = smov 122  }
   0x3   :  { %s71_s15 = smov 121  }
   0x9   :  { %v9_v1 = vld [vmem:[#allocation0] sm:$0x3]  }
   0xa   :  { %v21_v2 = vld [vmem:[#allocation0] sm:$0x3]   ;;  %10 = vrot.lane.b32.xlu0 %v9_v1, %s65_s0 }
   0xb   :  { %22 = vrot.lane.b32.xlu1 %v21_v2, %s66_s8  ;;  %v15_v3 = vld [vmem:[#allocation0] sm:$0x3]  }
   0xc   :  { %v27_v4 = vld [vmem:[#allocation0] sm:$0x3]  }
   0xd   :  { %v6_v5 = vld [vmem:[#allocation0] sm:$0x3]  }
   0xe   :  { %8 = vst.msk [vmem:[%s118_s1] ss:$8 sm:$0x3] %vm7_vm0, %v6_v5   ;;  %16 = vrot.lane.b32.xlu0 %v15_v3, %s67_s11  ;;  %v33_v6 = vld [vmem:[#allocation0] sm:$0x3]  }
   0xf   :  { %28 = vrot.lane.b32.xlu1 %v27_v4, %s68_s12  ;;  %v39_v7 = vld [vmem:[#allocation0] sm:$0x3]  }
  0x10   :  { %v45_v8 = vld [vmem:[#allocation0] sm:$0x3]  }
  0x12   :  { %34 = vrot.lane.b32.xlu0 %v33_v6, %s69_s13 }
  0x13   :  { %40 = vrot.lane.b32.xlu1 %v39_v7, %s70_s14 }
  0x16   :  { %46 = vrot.lane.b32.xlu0 %v45_v8, %s71_s15 }
  0x7c   :  { %v11_v9 = vpop.permute.xlu0 %10  }
  0x7d   :  { %v23_v10 = vpop.permute.xlu1 %22   ;;  %51 = vst.msk [vmem:[%s118_s1 + $0x1] ss:$8 sm:$0x3] %vm7_vm0, %v11_v9  }
  0x7e   :  { %53 = vst.msk [vmem:[%s118_s1 + $0x3] ss:$8 sm:$0x3] %vm7_vm0, %v23_v10  }
  0x80   :  { %v17_v11 = vpop.permute.xlu0 %16  }
  0x81   :  { %v29_v12 = vpop.permute.xlu1 %28   ;;  %52 = vst.msk [vmem:[%s118_s1 + $0x2] ss:$8 sm:$0x3] %vm7_vm0, %v17_v11  }
  0x82   :  { %54 = vst.msk [vmem:[%s118_s1 + $0x4] ss:$8 sm:$0x3] %vm7_vm0, %v29_v12  }
  0x84   :  { %v35_v13 = vpop.permute.xlu0 %34  }
  0x85   :  { %v41_v14 = vpop.permute.xlu1 %40   ;;  %55 = vst.msk [vmem:[%s118_s1 + $0x5] ss:$8 sm:$0x3] %vm7_vm0, %v35_v13  }
  0x86   :  { %56 = vst.msk [vmem:[%s118_s1 + $0x6] ss:$8 sm:$0x3] %vm7_vm0, %v41_v14  }
  0x88   :  { %v47_v15 = vpop.permute.xlu0 %46  }
  0x89   :  { %57 = vst.msk [vmem:[%s118_s1 + $0x7] ss:$8 sm:$0x3] %vm7_vm0, %v47_v15  }

// kernel: tc_model_forward.1
= control target key start
LH: loop header
LB: loop body
LE: loop exit
PB: predicated region body
PF: predicated region fallthrough
CT: control target
= control target key end

     0   :  { %s3701_s0 = inlined_call_operand.vmem [shape: s32[16,1], index: 0, kind: input, shape index: {}]   ;;  %s3702_s1 = inlined_call_operand.vmem [shape: s32[16,1], index: 1, kind: input, shape index: {}]   ;;  %s3703_s2 = inlined_call_operand.vmem [shape: s32[16,1], index: 2, kind: input, shape index: {}]   ;;  %s3704_s3 = inlined_call_operand.vmem [shape: s32[16,1], index: 3, kind: input, shape index: {}]   ;;  %s3705_s4 = inlined_call_operand.vmem [shape: s32[1,16], index: 4, kind: input, shape index: {}]   ;;  %s3706_s5 = inlined_call_operand.vmem [shape: f32[1,16], index: 5, kind: input, shape index: {}]   ;;  %s3707_s6 = inlined_call_operand.vmem [shape: s32[16,1], index: 6, kind: input, shape index: {}]   ;;  %s3708_s7 = inlined_call_operand.vmem [shape: s32[16,1], index: 7, kind: input, shape index: {}]   ;;  %s3709_s8 = inlined_call_operand.vmem [shape: f32[136,32], index: 8, kind: input, shape index: {}]   ;;  %s3710_s9 = inlined_call_operand.vmem [shape: f32[1,32], index: 9, kind: input, shape index: {}]   ;;  %s3711_s10 = inlined_call_operand.vmem [shape: f32[1,32], index: 10, kind: input, shape index: {}]   ;;  %s3712_s11 = inlined_call_operand.vmem [shape: f32[2,32,96], index: 11, kind: input, shape index: {}]   ;;  %s3713_s12 = inlined_call_operand.vmem [shape: f32[2,1,96], index: 12, kind: input, shape index: {}]   ;;  %s3714_s13 = inlined_call_operand.vmem [shape: f32[2,32,32], index: 13, kind: input, shape index: {}]   ;;  %s3715_s14 = inlined_call_operand.vmem [shape: f32[2,1,32], index: 14, kind: input, shape index: {}]   ;;  %s3716_s15 = inlined_call_operand.vmem [shape: f32[2,1,32], index: 15, kind: input, shape index: {}]   ;;  %s3717_s16 = inlined_call_operand.vmem [shape: f32[2,1,32], index: 16, kind: input, shape index: {}]   ;;  %s3718_s17 = inlined_call_operand.vmem [shape: f32[2,32,64], index: 17, kind: input, shape index: {}]   ;;  %s3719_s18 = inlined_call_operand.vmem [shape: f32[2,1,64], index: 18, kind: input, shape index: {}]   ;;  %s3720_s19 = inlined_call_operand.vmem [shape: f32[2,64,32], index: 19, kind: input, shape index: {}]   ;;  %s3721_s20 = inlined_call_operand.vmem [shape: f32[2,1,32], index: 20, kind: input, shape index: {}]   ;;  %s3722_s21 = inlined_call_operand.vmem [shape: f32[2,1,32], index: 21, kind: input, shape index: {}]   ;;  %s3723_s22 = inlined_call_operand.vmem [shape: f32[2,1,32], index: 22, kind: input, shape index: {}]   ;;  %s3724_s23 = inlined_call_operand.vmem [shape: f32[32,128], index: 23, kind: input, shape index: {}]   ;;  %s3725_s24 = inlined_call_operand.vmem [shape: f32[1,128], index: 24, kind: input, shape index: {}]   ;;  %s3726_s25 = inlined_call_operand.hbm [shape: f32[16,32], index: 25, kind: output, shape index: {0}]   ;;  %s3727_s26 = inlined_call_operand.vmem [shape: f32[16,128], index: 26, kind: output, shape index: {1}]   ;;  %s3728_s27 = inlined_call_operand.hbm [shape: f32[1,1], index: 27, kind: output, shape index: {2}]   ;;  %s3729_s28 = inlined_call_operand.vmem [shape: f32[16,1], index: 28, kind: output, shape index: {3}]  }
   0x1   :  { %3741 = sst [smem:[#allocation8_spill]] %s3701_s0 }
   0x2   :  { %3742 = sst [smem:[#allocation9_spill]] %s3702_s1 }
   0x3   :  { %3743 = sst [smem:[#allocation10_spill]] %s3703_s2 }
   0x4   :  { %3744 = sst [smem:[#allocation11_spill]] %s3704_s3 }
   0x5   :  { %3745 = sst [smem:[#allocation12_spill]] %s3705_s4 }
   0x6   :  { %3746 = sst [smem:[#allocation13_spill]] %s3706_s5 }
   0x7   :  { %3747 = sst [smem:[#allocation14_spill]] %s3707_s6 }
   0x8   :  { %3748 = sst [smem:[#allocation15_spill]] %s3708_s7 }
   0x9   :  { %3749 = sst [smem:[#allocation16_spill]] %s3709_s8 }
   0xa   :  { %3750 = sst [smem:[#allocation17_spill]] %s3710_s9 }
   0xb   :  { %3751 = sst [smem:[#allocation18_spill]] %s3711_s10 }
   0xc   :  { %3752 = sst [smem:[#allocation19_spill]] %s3712_s11 }
   0xd   :  { %3753 = sst [smem:[#allocation20_spill]] %s3713_s12 }
   0xe   :  { %34 = vsyncpa [#allocation3], 0  ;;  %s3754_s9 = sld [smem:[#allocation8_spill]]  ;;  %s3755_s6 = sld [smem:[#allocation9_spill]]  ;;  %v3037_v3 = vmov 0   ;;  %v3038_v6 = vmov 0.0|0.0  }
   0xf   :  { %s3756_s11 = sld [smem:[#allocation10_spill]]  ;;  %2877 = vset.pattern.permute.xlu0 %v3037_v3  ;;  %2878 = vset.pattern.permute.xlu1 %v3037_v3  ;;  %s3757_s7 = sld [smem:[#allocation16_spill]] }
  0x10   :  { %2703 = vmatprep.subr.bf16.mxu0 %v3038_v6 }
  0x14   :  { %v86_v0 = vld [vmem:[%s3754_s9] sm:$0xff]  ;;  %v87_v13 = vld [vmem:[%s3754_s9 + $0x8] sm:$0xff] }
  0x15   :  { %v88_v1 = vld [vmem:[%s3755_s6] sm:$0xff]  ;;  %96 = vperm.xlu0 %2877, %v86_v0   ;;  %v146_v8 = vld [vmem:[%s3757_s7 + $0x8] sm:$0xff]  ;;  %v147_v9 = vld [vmem:[%s3757_s7 + $0x10] sm:$0xff] }
  0x16   :  { %v90_v2 = vld [vmem:[%s3756_s11] sm:$0xff]  ;;  %v121_v4 = vadd.s32 132, %v88_v1  ;;  %v91_v10 = vld [vmem:[%s3756_s11 + $0x8] sm:$0xff]  ;;  %v148_v12 = vld [vmem:[%s3757_s7 + $0x18] sm:$0xff] }
  0x17   :  { %v105_v5 = vadd.s32 100, %v90_v2  ;;  %v145_v7 = vld [vmem:[%s3757_s7] sm:$0xff]  ;;  %v89_v14 = vld [vmem:[%s3755_s6 + $0x8] sm:$0xff]  ;;  %v2707_v15 = vpack.c.bf16 %v148_v12, %v147_v9  ;;  %v106_v16 = vadd.s32 100, %v91_v10 }
  0x18   :  { %124 = vperm.xlu1 %2878, %v121_v4   ;;  %v2704_v11 = vpack.c.bf16 %v146_v8, %v145_v7  ;;  %v149_v17 = vld [vmem:[%s3757_s7 + $0x20] sm:$0xff]  ;;  %v150_v18 = vld [vmem:[%s3757_s7 + $0x28] sm:$0xff]  ;;  %v122_v19 = vadd.s32 132, %v89_v14 }
  0x19   :  { %108 = vperm.xlu0 %2877, %v105_v5  }
  0x1a   :  { %2705 = vmatpush1.bf16.msra.mxu0 %v2704_v11 }
  0x1b   :  { %2706 = vmatprep.subr.bf16.mxu0 %v3038_v6 }
  0x1c   :  { %99 = vperm.xlu1 %2878, %v87_v13  }
  0x1d   :  { %35 = vsyncpa [#allocation5], 0  ;;  %v2710_v20 = vpack.c.bf16 %v150_v18, %v149_v17  ;;  %111 = vperm.xlu0 %2877, %v106_v16   ;;  %v151_v21 = vld [vmem:[%s3757_s7 + $0x30] sm:$0xff]  ;;  %v152_v22 = vld [vmem:[%s3757_s7 + $0x38] sm:$0xff]  ;;  %v3039_v36 = vmov 0.0   ;;  %v92_v38 = vlaneseq  ;;  %vm162_vm7 = vcmask 64512  }
  0x1e   :  { %2708 = vmatpush1.bf16.msra.mxu0 %v2707_v15  ;;  %v2713_v23 = vpack.c.bf16 %v152_v22, %v151_v21  ;;  %v153_v24 = vld [vmem:[%s3757_s7 + $0x40] sm:$0xff]  ;;  %v154_v25 = vld [vmem:[%s3757_s7 + $0x48] sm:$0xff]  ;;  %v155_v27 = vld [vmem:[%s3757_s7 + $0x50] sm:$0xff]  ;;  %v3040_v48 = vmov 1.0   ;;  %s3758_s12 = sld [smem:[#allocation11_spill]]  ;;  %s3760_s29 = sld [smem:[#allocation17_spill]] }
  0x1f   :  { %2709 = vmatprep.subr.bf16.mxu0 %v3038_v6  ;;  %v2716_v26 = vpack.c.bf16 %v154_v25, %v153_v24  ;;  %v156_v28 = vld [vmem:[%s3757_s7 + $0x58] sm:$0xff]  ;;  %v157_v30 = vld [vmem:[%s3757_s7 + $0x60] sm:$0xff]  ;;  %v158_v31 = vld [vmem:[%s3757_s7 + $0x68] sm:$0xff]  ;;  %v3271_v39 = vand.u32 127, %v92_v38  ;;  %s3759_s4 = sld [smem:[#allocation19_spill]]  ;;  %s3761_s1 = sld [smem:[#allocation18_spill]] }
  0x20   :  { %127 = vperm.xlu1 %2878, %v122_v19   ;;  %v2719_v29 = vpack.c.bf16 %v156_v28, %v155_v27  ;;  %v2722_v32 = vpack.c.bf16 %v158_v31, %v157_v30  ;;  %v159_v33 = vld [vmem:[%s3757_s7 + $0x70] sm:$0xff]  ;;  %v160_v34 = vld [vmem:[%s3757_s7 + $0x78] sm:$0xff]  ;;  %v161_v37 = vld [vmem:[%s3757_s7 + $0x80] sm:$0xff]  ;;  %s3762_s9 = sld [smem:[#allocation20_spill]]  ;;  %s3041_s6 = smov 96  }
  0x21   :  { %v2725_v35 = vpack.c.bf16 %v160_v34, %v159_v33  ;;  %v94_v42 = vadd.s32 128, %v3271_v39  ;;  %s3765_s10 = sld [smem:[#allocation13_spill]]  ;;  %s3766_s7 = sld [smem:[#allocation12_spill]] }
  0x22   :  { %2711 = vmatpush1.bf16.msra.mxu0 %v2710_v20  ;;  %s3043_s2 = smov 80   ;;  %s3045_s11 = smov 64  }
  0x23   :  { %2712 = vmatprep.subr.bf16.mxu0 %v3038_v6  ;;  %s3046_s8 = smov 48   ;;  %s3739_s5 = smov 16  }
  0x24   :  { %v290_v2 = vld [vmem:[%s3758_s12] sm:$0xff] }
  0x25   :  { %v317_v4 = vld [vmem:[%s3759_s4] sm:$0xff]  ;;  %v318_v5 = vld [vmem:[%s3759_s4 + $0x8] sm:$0xff]  ;;  %v320_v8 = vld [vmem:[%s3759_s4 + $0x18] sm:$0xff] }
  0x26   :  { %2714 = vmatpush1.bf16.msra.mxu0 %v2713_v23  ;;  %v2727_v7 = vpack.c.bf16 %v318_v5, %v317_v4  ;;  %v2344_v17 = vld [vmem:[%s3760_s29] ss:$0 sm:$0xff]  ;;  %s3768_s29 = sld [smem:[#allocation15_spill]] }
  0x27   :  { %2715 = vmatprep.subr.bf16.mxu0 %v3038_v6  ;;  %v2345_v19 = vld [vmem:[%s3761_s1] ss:$0 sm:$0xff]  ;;  %s3044_s1 = smov 112  }
  0x28   :  { %2728 = vmatprep.subr.bf16.mxu1 %v2727_v7 }
  0x29   :  { %2730 = vmatpush3.bf16.msra.mxu1 %v2727_v7 }
  0x2a   :  { %2717 = vmatpush1.bf16.msra.mxu0 %v2716_v26  ;;  %v2347_v26 = vld [vmem:[%s3762_s9] ss:$0 sm:$0xff] }
  0x2b   :  { %2718 = vmatprep.subr.bf16.mxu0 %v3038_v6 }
  0x2e   :  { %2720 = vmatpush1.bf16.msra.mxu0 %v2719_v29 }
  0x2f   :  { %2721 = vmatprep.subr.bf16.mxu0 %v3038_v6 }
  0x32   :  { %2723 = vmatpush1.bf16.msra.mxu0 %v2722_v32  ;;  %v291_v32 = vld [vmem:[%s3758_s12 + $0x8] sm:$0xff]  ;;  %s3767_s12 = smov 16  }
  0x33   :  { %2724 = vmatprep.subr.bf16.mxu0 %v3038_v6  ;;  %v319_v6 = vld [vmem:[%s3759_s4 + $0x10] sm:$0xff] }
  0x34   :  { %v2731_v9 = vpack.c.bf16 %v320_v8, %v319_v6 }
  0x36   :  { %2726 = vmatpush1.bf16.msra.mxu0 %v2725_v35  ;;  %2732 = vmatprep.subr.bf16.mxu1 %v2731_v9 }
  0x37   :  { %201 = vmatprep.subr.mxu0 %v3039_v36  ;;  %2734 = vmatpush3.bf16.msra.mxu1 %v2731_v9 }
  0x3a   :  { %202 = vmatpush1.msra.mxu0 %v161_v37 }
  0x94   :  { %v97_v40 = vpop.permute.xlu0 %96 }
  0x95   :  { %vm101_vm0 = vcmp.eq.s32.totalorder %v3271_v39, %v97_v40  ;;  %vm102_vm3 = vcmp.eq.s32.totalorder %v94_v42, %v97_v40 }
  0x97   :  { %v125_v41 = vpop.permute.xlu1 %124 }
  0x98   :  { %v109_v43 = vpop.permute.xlu0 %108  ;;  %vm130_vm5 = vcmp.eq.s32.totalorder %v94_v42, %v125_v41  ;;  %vm129_vm9 = vcmp.eq.s32.totalorder %v3271_v39, %v125_v41  ;;  %v305_v41 = vld [vmem:[%s3765_s10] sm:$0x1] }
  0x99   :  { %vm113_vm1 = vcmp.eq.s32.totalorder %v3271_v39, %v109_v43  ;;  %vm114_vm2 = vcmp.eq.s32.totalorder %v94_v42, %v109_v43 }
  0x9a   :  { %vm117_vm4 = vmor %vm101_vm0, %vm113_vm1 }
  0x9b   :  { %v100_v44 = vpop.permute.xlu1 %99  ;;  %vm118_vm6 = vmor %vm102_vm3, %vm114_vm2 }
  0x9c   :  { %v112_v45 = vpop.permute.xlu0 %111  ;;  %vm134_vm8 = vmor %vm118_vm6, %vm130_vm5  ;;  %vm104_vm12 = vcmp.eq.s32.totalorder %v94_v42, %v100_v44  ;;  %vm103_vm15 = vcmp.eq.s32.totalorder %v3271_v39, %v100_v44  ;;  %vm246_vm6 = vcmask 261120  }
  0x9d   :  { %vm115_vm10 = vcmp.eq.s32.totalorder %v3271_v39, %v112_v45  ;;  %vm116_vm11 = vcmp.eq.s32.totalorder %v94_v42, %v112_v45  ;;  %v2337_v47 = vsel %vm134_vm8, 1.0, %v3039_v36  ;;  %vm133_vm14 = vmor %vm117_vm4, %vm129_vm9  ;;  %vm415_vm4 = vcmask 130048  }
  0x9e   :  { %2340 = vmatprep.mubr.msk.f32.mxu0 %vm162_vm7, %v2337_v47  ;;  %vm120_vm0 = vmor %vm104_vm12, %vm116_vm11  ;;  %vm306_vm8 = vcmp.gt.f32.partialorder %v305_v41, 0.5  ;;  %v2346_v47 = vld [vmem:[%s3766_s7] ss:$0 sm:$0xff]  ;;  %s3048_s7 = smov [#allocation2]  }
  0x9f   :  { %v128_v46 = vpop.permute.xlu1 %127  ;;  %2341 = vmatmul.mubr.msk.f32.vlgmr.msra.gmra.mrb[0].mxu0 %vm133_vm14, %v3040_v48  ;;  %vm119_vm1 = vmor %vm103_vm15, %vm115_vm10  ;;  %v307_v44 = vsel %vm306_vm8, 1, %v3037_v3  ;;  %vm1081_vm14 = vcmask 523264  }
  0xa0   :  { %vm132_vm13 = vcmp.eq.s32.totalorder %v94_v42, %v128_v46  ;;  %vm131_vm2 = vcmp.eq.s32.totalorder %v3271_v39, %v128_v46  ;;  %v309_v42 = vshrl.u32 %v92_v38, 7 }
  0xa1   :  { %vm136_vm3 = vmor %vm120_vm0, %vm132_vm13 }
  0xa2   :  { %v2339_v49 = vsel %vm136_vm3, 1.0, %v3039_v36  ;;  %vm135_vm5 = vmor %vm119_vm1, %vm131_vm2  ;;  %v310_v43 = vsub.s32 0, %v309_v42 }
  0xa3   :  { %2342 = vmatprep.mubr.msk.f32.mxu0 %vm162_vm7, %v2339_v49  ;;  %vm3330_vm7 = vmpackc.low %vm415_vm4, %vm415_vm4  ;;  %v3042_v49 = vmov -10000.0  }
  0xa4   :  { %2343 = vmatmul.mubr.msk.f32.gmra.mrb[2].mxu0 %vm135_vm5, %v3040_v48  ;;  %v311_v45 = vrot.slane %v307_v44, %v310_v43 }
  0xa6   :  { %vm312_vm10 = vcmp.eq.s32.totalorder %v311_v45, 1 }
 0x172   :  { %v235_v50 = vpop.f32.mrb[0].mxu0 }
 0x173   :  { %v237_v51 = vpop.f32.mrb[1].mxu0  ;;  %v247_v52 = vsel %vm246_vm6, %v235_v50, 0.0 }
 0x174   :  { %248 = vadd.xlane.f32.xlu0 %v247_v52 }
 0x177   :  { %v240_v53 = vpop.f32.mrb[2].mxu0 }
 0x178   :  { %v242_v54 = vpop.f32.mrb[3].mxu0  ;;  %v250_v55 = vsel %vm246_vm6, %v240_v53, 0.0 }
 0x179   :  { %251 = vadd.xlane.f32.xlu1 %v250_v55 }
 0x201   :  { %v249_v56 = vpop.xlane.xlu0 %248 }
 0x202   :  { %v254_v57 = vmul.f32 0.03125, %v249_v56 }
 0x204   :  { %v256_v58 = vsub.f32 %v235_v50, %v254_v57 }
 0x206   :  { %v252_v59 = vpop.xlane.xlu1 %251  ;;  %v258_v60 = vmul.f32 %v256_v58, %v256_v58 }
 0x207   :  { %v255_v61 = vmul.f32 0.03125, %v252_v59 }
 0x208   :  { %v260_v62 = vsel %vm246_vm6, %v258_v60, 0.0 }
 0x209   :  { %v257_v63 = vsub.f32 %v240_v53, %v255_v61  ;;  %261 = vadd.xlane.f32.xlu0 %v260_v62 }
 0x20b   :  { %v259_v0 = vmul.f32 %v257_v63, %v257_v63 }
 0x20d   :  { %v263_v1 = vsel %vm246_vm6, %v259_v0, 0.0 }
 0x20e   :  { %264 = vadd.xlane.f32.xlu0 %v263_v1 }
 0x224   :  { %294 = vperm.xlu0 %2877, %v290_v2  }
 0x296   :  { %v262_v10 = vpop.xlane.xlu0 %261 }
 0x297   :  { %v266_v11 = vmul.f32 0.03125, %v262_v10 }
 0x299   :  { %v268_v12 = vadd.f32 1e-12, %v266_v11 }
 0x29b   :  { %2919 = vrsqrt.f32 %v268_v12  ;;  %v265_v13 = vpop.xlane.xlu0 %264 }
 0x29c   :  { %v267_v14 = vmul.f32 0.03125, %v265_v13 }
 0x29e   :  { %v269_v15 = vadd.f32 1e-12, %v267_v14 }
 0x2a0   :  { %2921 = vrsqrt.f32 %v269_v15 }
 0x2a3   :  { %v295_v48 = vpop.permute.xlu0 %294 }
 0x2a4   :  { %vm303_vm11 = vcmp.eq.s32.totalorder %v295_v48, %v2346_v47 }
 0x2a5   :  { %v2920_v16 = vpop.eup %2919  ;;  %vm313_vm13 = vmand %vm303_vm11, %vm312_vm10 }
 0x2a6   :  { %v272_v18 = vmul.f32 %v2920_v16, %v256_v58  ;;  %v3349_v51 = vsel %vm313_vm13, 0.0, %v3042_v49 }
 0x2a8   :  { %v280_v20 = vmul.f32 %v2344_v17, %v272_v18 }
 0x2aa   :  { %v2922_v21 = vpop.eup %2921  ;;  %v3309_v22 = vadd.f32 %v2345_v19, %v280_v20 }
 0x2ab   :  { %v273_v23 = vmul.f32 %v2922_v21, %v257_v63 }
 0x2ac   :  { %2540 = vmatprep.mubr.msk.f32.mxu1 %vm246_vm6, %v3309_v22 }
 0x2ad   :  { %v281_v24 = vmul.f32 %v2344_v17, %v273_v23 }
 0x2af   :  { %v3313_v25 = vadd.f32 %v2345_v19, %v281_v24 }
 0x2b1   :  { %2541 = vmatmul.mubr.msk.f32.vlgmr.msra.gmra.mrb[0].mxu1 %vm246_vm6, %v3313_v25 }
 0x384   :  { %v2542_v27 = vpop.f32.mrb[0].mxu1 }
 0x385   :  { %v406_v28 = vadd.f32 %v2542_v27, %v2347_v26  ;;  %v400_v29 = vpop.f32.mrb[1].mxu1 }
 0x386   :  { %v401_v30 = vadd.f32 %v2347_v26, %v400_v29 }
 0x388   :  { %2547 = vmatprep.mubr.msk.f32.mxu1 %vm415_vm4, %v401_v30  ;;  %v3321_v31 = vpack.i.bf16 %v406_v28, %v401_v30 }
 0x38a   :  { %2880 = vrot.lane.b32.xlu1 %v3321_v31, %s3041_s6 }
 0x38e   :  { %297 = vperm.xlu1 %2878, %v291_v32  }
 0x3fc   :  { %v2881_v33 = vpop.permute.xlu1 %2880 }
 0x3fd   :  { %v2883_v34 = vunpack.i.h.bf16 %v2881_v33  ;;  %v2882_v35 = vunpack.i.l.bf16 %v2881_v33 }
 0x3ff   :  { %v2735_v40 = vpack.c.bf16 %v2883_v34, %v2882_v35 }
 0x401   :  { %2737 = vmatprep.subr.msk.bf16.mxu1 %vm3330_vm7, %v2735_v40 }
 0x402   :  { %2740 = vmatpush3.bf16.xpose.msk.msra.mxu1 %vm3330_vm7, %v2735_v40 }
 0x409   :  { %2548 = vmatmul.mubr.msk.f32.vlgmr.msra.gmra.mrb[2].mxu1 %vm415_vm4, %v406_v28 }
 0x40d   :  { %v298_v46 = vpop.permute.xlu1 %297 }
 0x40e   :  { %vm304_vm9 = vcmp.eq.s32.totalorder %v298_v46, %v2346_v47 }
 0x40f   :  { %vm314_vm12 = vmand %vm304_vm9, %vm312_vm10 }
 0x410   :  { %v3347_v50 = vsel %vm314_vm12, 0.0, %v3042_v49 }
 0x4dc   :  { %v2549_v38 = vpop.f32.mrb[2].mxu1 }
 0x4dd   :  { %v496_v3 = vadd.f32 %v2549_v38, %v3347_v50  ;;  %v490_v52 = vpop.f32.mrb[3].mxu1 }
 0x4de   :  { %v491_v53 = vadd.f32 %v490_v52, %v3349_v51 }
 0x4df   :  { %v502_v54 = vsel %vm415_vm4, %v496_v3, -inf }
 0x4e0   :  { %503 = vmax.xlane.f32.xlu0 %v502_v54  ;;  %v499_v55 = vsel %vm415_vm4, %v491_v53, -inf  ;;  %v819_v54 = vld [vmem:[%s3714_s13 + $0x8] sm:$0xff] }
 0x4e1   :  { %500 = vmax.xlane.f32.xlu1 %v499_v55 }
 0x56d   :  { %v504_v56 = vpop.xlane.xlu0 %503 }
 0x56e   :  { %v506_v57 = vsub.f32 %v496_v3, %v504_v56  ;;  %v501_v58 = vpop.xlane.xlu1 %500  ;;  %v820_v56 = vld [vmem:[%s3714_s13 + $0x10] sm:$0xff] }
 0x56f   :  { %v505_v59 = vsub.f32 %v491_v53, %v501_v58 }
 0x570   :  { %v509_v60 = vmul.f32 1.442695, %v506_v57  ;;  %v821_v57 = vld [vmem:[%s3714_s13 + $0x18] sm:$0xff] }
 0x571   :  { %v507_v61 = vmul.f32 1.442695, %v505_v59  ;;  %v2759_v58 = vpack.c.bf16 %v821_v57, %v820_v56  ;;  %v1072_v56 = vld [vmem:[%s3720_s19 + $0x30] sm:$0xff]  ;;  %v1073_v57 = vld [vmem:[%s3720_s19 + $0x38] sm:$0xff] }
 0x572   :  { %2923 = vpow2.f32 %v509_v60 }
 0x573   :  { %2925 = vpow2.f32 %v507_v61 }
 0x57c   :  { %v2924_v62 = vpop.eup %2923 }
 0x57d   :  { %v2926_v63 = vpop.eup %2925  ;;  %v514_v0 = vsel %vm415_vm4, %v2924_v62, 0.0 }
 0x57e   :  { %515 = vadd.xlane.f32.xlu1 %v514_v0  ;;  %v511_v1 = vsel %vm415_vm4, %v2926_v63, 0.0 }
 0x57f   :  { %512 = vadd.xlane.f32.xlu0 %v511_v1  ;;  %v2362_v1 = vld [vmem:[%s3715_s14] ss:$0 sm:$0xff] }
 0x58f   :  { %2890 = vrot.lane.b32.xlu1 %v3321_v31, %s3043_s2 }
 0x593   :  { %608 = vrot.lane.b32.xlu1 %v401_v30, %s3044_s1 }
 0x595   :  { %2885 = vrot.lane.b32.xlu0 %v3321_v31, %s3045_s11 }
 0x599   :  { %610 = vrot.lane.b32.xlu0 %v406_v28, %s3044_s1 }
 0x60b   :  { %v516_v2 = vpop.xlane.xlu1 %515 }
 0x60c   :  { %2927 = vrcp.f32 %v516_v2  ;;  %v513_v4 = vpop.xlane.xlu0 %512 }
 0x60d   :  { %2929 = vrcp.f32 %v513_v4 }
 0x60f   :  { %v2891_v5 = vpop.permute.xlu1 %2890 }
 0x610   :  { %v2886_v6 = vpop.permute.xlu0 %2885  ;;  %v2893_v7 = vunpack.i.h.bf16 %v2891_v5  ;;  %v2892_v8 = vunpack.i.l.bf16 %v2891_v5 }
 0x611   :  { %v2888_v9 = vunpack.i.h.bf16 %v2886_v6  ;;  %v2887_v10 = vunpack.i.l.bf16 %v2886_v6 }
 0x612   :  { %v2745_v12 = vpack.c.bf16 %v2893_v7, %v2892_v8 }
 0x613   :  { %v2741_v11 = vpack.c.bf16 %v2888_v9, %v2887_v10  ;;  %v609_v17 = vpop.permute.xlu1 %608 }
 0x614   :  { %v611_v18 = vpop.permute.xlu0 %610 }
 0x615   :  { %2742 = vmatprep.subr.bf16.mxu1 %v2741_v11 }
 0x616   :  { %v2928_v13 = vpop.eup %2927  ;;  %2744 = vmatpush3.bf16.msra.mxu1 %v2741_v11 }
 0x617   :  { %v2930_v14 = vpop.eup %2929  ;;  %2747 = vmatprep.subr.msk.bf16.mxu1 %vm3330_vm7, %v2745_v12  ;;  %v520_v16 = vmul.f32 %v2928_v13, %v2924_v62 }
 0x618   :  { %v519_v15 = vmul.f32 %v2930_v14, %v2926_v63 }
 0x61a   :  { %2554 = vmatprep.mubr.msk.f32.mxu1 %vm415_vm4, %v519_v15 }
 0x61b   :  { %2555 = vmatmul.mubr.msk.f32.vlgmr.msra.gmra.mrb[4].mxu1 %vm415_vm4, %v520_v16 }
 0x61c   :  { %2561 = vmatprep.mubr.msk.f32.mxu1 %vm415_vm4, %v609_v17 }
 0x61f   :  { %2750 = vmatpush3.bf16.xpose.msk.msra.mxu1 %vm3330_vm7, %v2745_v12 }
 0x626   :  { %2562 = vmatmul.mubr.msk.f32.vlgmr.msra.gmra.mrb[6].mxu1 %vm415_vm4, %v611_v18 }
 0x6ee   :  { %v2556_v19 = vpop.f32.mrb[4].mxu1 }
 0x6ef   :  { %v599_v20 = vpop.f32.mrb[5].mxu1 }
 0x6f9   :  { %v2563_v21 = vpop.f32.mrb[6].mxu1 }
 0x6fa   :  { %v696_v23 = vadd.f32 %v2563_v21, %v3347_v50  ;;  %v690_v24 = vpop.f32.mrb[7].mxu1 }
 0x6fb   :  { %v691_v26 = vadd.f32 %v690_v24, %v3349_v51  ;;  %v959_v24 = vld [vmem:[%s3718_s17 + $0x18] sm:$0xff] }
 0x6fc   :  { %v702_v27 = vsel %vm415_vm4, %v696_v23, -inf }
 0x6fd   :  { %703 = vmax.xlane.f32.xlu0 %v702_v27  ;;  %v699_v28 = vsel %vm415_vm4, %v691_v26, -inf }
 0x6fe   :  { %700 = vmax.xlane.f32.xlu1 %v699_v28 }
 0x78a   :  { %v704_v29 = vpop.xlane.xlu0 %703 }
 0x78b   :  { %v706_v30 = vsub.f32 %v696_v23, %v704_v29  ;;  %v701_v32 = vpop.xlane.xlu1 %700  ;;  %v958_v23 = vld [vmem:[%s3718_s17 + $0x10] sm:$0xff] }
 0x78c   :  { %v705_v33 = vsub.f32 %v691_v26, %v701_v32  ;;  %v2767_v26 = vpack.c.bf16 %v959_v24, %v958_v23 }
 0x78d   :  { %v709_v34 = vmul.f32 1.442695, %v706_v30 }
 0x78e   :  { %v707_v35 = vmul.f32 1.442695, %v705_v33 }
 0x78f   :  { %2931 = vpow2.f32 %v709_v34 }
 0x790   :  { %2933 = vpow2.f32 %v707_v35  ;;  %v2365_v35 = vld [vmem:[%s3716_s15] ss:$0 sm:$0xff] }
 0x799   :  { %v2932_v40 = vpop.eup %2931 }
 0x79a   :  { %v2934_v41 = vpop.eup %2933  ;;  %v714_v42 = vsel %vm415_vm4, %v2932_v40, 0.0 }
 0x79b   :  { %715 = vadd.xlane.f32.xlu1 %v714_v42  ;;  %v711_v43 = vsel %vm415_vm4, %v2934_v41, 0.0 }
 0x79c   :  { %712 = vadd.xlane.f32.xlu0 %v711_v43 }
 0x7b2   :  { %2895 = vrot.lane.b32.xlu0 %v3321_v31, %s3046_s8  ;;  %v818_v31 = vld [vmem:[%s3714_s13] sm:$0xff] }
 0x7b3   :  { %v2755_v55 = vpack.c.bf16 %v819_v54, %v818_v31  ;;  %v1070_v31 = vld [vmem:[%s3720_s19 + $0x20] sm:$0xff]  ;;  %v1071_v54 = vld [vmem:[%s3720_s19 + $0x28] sm:$0xff] }
 0x828   :  { %v716_v44 = vpop.xlane.xlu1 %715 }
 0x829   :  { %2935 = vrcp.f32 %v716_v44  ;;  %v713_v45 = vpop.xlane.xlu0 %712 }
 0x82a   :  { %2937 = vrcp.f32 %v713_v45 }
 0x82d   :  { %v2896_v46 = vpop.permute.xlu0 %2895 }
 0x82e   :  { %v2898_v47 = vunpack.i.h.bf16 %v2896_v46  ;;  %v2897_v48 = vunpack.i.l.bf16 %v2896_v46 }
 0x830   :  { %v2751_v49 = vpack.c.bf16 %v2898_v47, %v2897_v48  ;;  %v1066_v48 = vld [vmem:[%s3720_s19] sm:$0xff] }
 0x832   :  { %2752 = vmatprep.subr.bf16.mxu1 %v2751_v49 }
 0x833   :  { %v2936_v38 = vpop.eup %2935  ;;  %2754 = vmatpush3.bf16.msra.mxu1 %v2751_v49  ;;  %v1067_v49 = vld [vmem:[%s3720_s19 + $0x8] sm:$0xff] }
 0x834   :  { %v2938_v3 = vpop.eup %2937  ;;  %v720_v53 = vmul.f32 %v2936_v38, %v2932_v40  ;;  %2756 = vmatprep.subr.bf16.mxu1 %v2755_v55  ;;  %v2771_v38 = vpack.c.bf16 %v1067_v49, %v1066_v48 }
 0x835   :  { %v719_v52 = vmul.f32 %v2938_v3, %v2934_v41  ;;  %v2366_v41 = vld [vmem:[%s3717_s16] ss:$0 sm:$0xff]  ;;  %v1068_v3 = vld [vmem:[%s3720_s19 + $0x10] sm:$0xff] }
 0x837   :  { %2568 = vmatprep.mubr.msk.f32.mxu1 %vm415_vm4, %v719_v52  ;;  %v1069_v52 = vld [vmem:[%s3720_s19 + $0x18] sm:$0xff] }
 0x838   :  { %2569 = vmatmul.mubr.msk.f32.vlgmr.msra.gmra.mrb[8].mxu1 %vm415_vm4, %v720_v53  ;;  %v2775_v53 = vpack.c.bf16 %v1069_v52, %v1068_v3 }
 0x839   :  { %2758 = vmatpush3.bf16.msra.mxu1 %v2755_v55  ;;  %v2779_v55 = vpack.c.bf16 %v1071_v54, %v1070_v31 }
 0x83a   :  { %2760 = vmatprep.subr.bf16.mxu1 %v2759_v58 }
 0x83d   :  { %2762 = vmatpush3.bf16.msra.mxu1 %v2759_v58  ;;  %v2783_v58 = vpack.c.bf16 %v1073_v57, %v1072_v56 }
 0x83e   :  { %2772 = vmatprep.subr.bf16.mxu1 %v2771_v38 }
 0x90b   :  { %v2570_v59 = vpop.f32.mrb[8].mxu1 }
 0x90c   :  { %v799_v60 = vpop.f32.mrb[9].mxu1 }
 0x90d   :  { %810 = vrot.lane.b32.xlu1 %v799_v60, %s3739_s5 }
 0x911   :  { %812 = vrot.lane.b32.xlu1 %v2570_v59, %s3739_s5  ;;  %v2367_v59 = vld [vmem:[%s3719_s18] ss:$0 sm:$0xff] }
 0x97f   :  { %v811_v61 = vpop.permute.xlu1 %810 }
 0x980   :  { %v816_v62 = vsel %vm415_vm4, %v599_v20, %v811_v61  ;;  %v957_v20 = vld [vmem:[%s3718_s17 + $0x8] sm:$0xff] }
 0x981   :  { %2579 = vmatprep.mubr.msk.f32.mxu1 %vm246_vm6, %v816_v62 }
 0x983   :  { %v813_v63 = vpop.permute.xlu1 %812 }
 0x984   :  { %v817_v0 = vsel %vm415_vm4, %v2556_v19, %v813_v63 }
 0x985   :  { %2580 = vmatmul.mubr.msk.f32.vlgmr.msra.gmra.mrb[10].mxu1 %vm246_vm6, %v817_v0 }
 0x986   :  { %2774 = vmatpush3.bf16.msra.mxu1 %v2771_v38 }
 0x987   :  { %2776 = vmatprep.subr.bf16.mxu1 %v2775_v53 }
 0x98a   :  { %2778 = vmatpush3.bf16.msra.mxu1 %v2775_v53 }
 0x98b   :  { %2780 = vmatprep.subr.bf16.mxu1 %v2779_v55 }
 0x98e   :  { %2782 = vmatpush3.bf16.msra.mxu1 %v2779_v55  ;;  %v2373_v55 = vld [vmem:[%s3722_s21] ss:$0 sm:$0xff] }
 0x98f   :  { %2784 = vmatprep.subr.bf16.mxu1 %v2783_v58 }
 0x992   :  { %2786 = vmatpush3.bf16.msra.mxu1 %v2783_v58 }
 0xa58   :  { %v2581_v2 = vpop.f32.mrb[10].mxu1 }
 0xa59   :  { %v907_v4 = vadd.f32 %v2581_v2, %v2362_v1  ;;  %v901_v5 = vpop.f32.mrb[11].mxu1 }
 0xa5a   :  { %v902_v6 = vadd.f32 %v2362_v1, %v901_v5 }
 0xa5b   :  { %v911_v7 = vadd.f32 %v907_v4, %v3313_v25 }
 0xa5c   :  { %v910_v8 = vadd.f32 %v902_v6, %v3309_v22  ;;  %v956_v22 = vld [vmem:[%s3718_s17] sm:$0xff] }
 0xa5d   :  { %v917_v9 = vsel %vm246_vm6, %v911_v7, 0.0  ;;  %v2763_v21 = vpack.c.bf16 %v957_v20, %v956_v22 }
 0xa5e   :  { %918 = vadd.xlane.f32.xlu1 %v917_v9  ;;  %v914_v10 = vsel %vm246_vm6, %v910_v8, 0.0 }
 0xa5f   :  { %915 = vadd.xlane.f32.xlu0 %v914_v10  ;;  %2764 = vmatprep.subr.bf16.mxu0 %v2763_v21 }
 0xa60   :  { %2766 = vmatpush3.bf16.msra.mxu0 %v2763_v21 }
 0xa61   :  { %2768 = vmatprep.subr.bf16.mxu0 %v2767_v26 }
 0xa64   :  { %2770 = vmatpush3.bf16.msra.mxu0 %v2767_v26 }
 0xaeb   :  { %v919_v11 = vpop.xlane.xlu1 %918 }
 0xaec   :  { %v921_v12 = vmul.f32 0.03125, %v919_v11  ;;  %v916_v13 = vpop.xlane.xlu0 %915 }
 0xaed   :  { %v920_v14 = vmul.f32 0.03125, %v916_v13 }
 0xaee   :  { %v923_v15 = vsub.f32 %v911_v7, %v921_v12 }
 0xaef   :  { %v922_v16 = vsub.f32 %v910_v8, %v920_v14 }
 0xaf0   :  { %v925_v19 = vmul.f32 %v923_v15, %v923_v15 }
 0xaf1   :  { %v924_v17 = vmul.f32 %v922_v16, %v922_v16 }
 0xaf2   :  { %v929_v25 = vsel %vm246_vm6, %v925_v19, 0.0  ;;  %v2370_v19 = vld [vmem:[%s3721_s20] ss:$0 sm:$0xff] }
 0xaf3   :  { %v926_v18 = vsel %vm246_vm6, %v924_v17, 0.0 }
 0xaf4   :  { %927 = vadd.xlane.f32.xlu0 %v926_v18 }
 0xaf8   :  { %930 = vadd.xlane.f32.xlu0 %v929_v25 }
 0xb81   :  { %v928_v27 = vpop.xlane.xlu0 %927 }
 0xb82   :  { %v932_v28 = vmul.f32 0.03125, %v928_v27 }
 0xb84   :  { %v934_v29 = vadd.f32 1e-12, %v932_v28 }
 0xb85   :  { %v931_v30 = vpop.xlane.xlu0 %930 }
 0xb86   :  { %2939 = vrsqrt.f32 %v934_v29  ;;  %v933_v32 = vmul.f32 0.03125, %v931_v30 }
 0xb88   :  { %v935_v33 = vadd.f32 1e-12, %v933_v32 }
 0xb8a   :  { %2941 = vrsqrt.f32 %v935_v33 }
 0xb90   :  { %v2940_v34 = vpop.eup %2939 }
 0xb91   :  { %v938_v40 = vmul.f32 %v2940_v34, %v922_v16 }
 0xb93   :  { %v946_v42 = vmul.f32 %v2365_v35, %v938_v40 }
 0xb94   :  { %v2942_v43 = vpop.eup %2941 }
 0xb95   :  { %v939_v44 = vmul.f32 %v2942_v43, %v923_v15  ;;  %v954_v45 = vadd.f32 %v2366_v41, %v946_v42  ;;  %v2375_v43 = vld [vmem:[%s3759_s4 + $0x20] sm:$0xff] }
 0xb97   :  { %v947_v46 = vmul.f32 %v2365_v35, %v939_v44  ;;  %2590 = vmatprep.mubr.msk.f32.mxu0 %vm246_vm6, %v954_v45  ;;  %v2376_v44 = vld [vmem:[%s3759_s4 + $0x28] sm:$0xff] }
 0xb99   :  { %v955_v47 = vadd.f32 %v2366_v41, %v947_v46  ;;  %v2377_v46 = vld [vmem:[%s3759_s4 + $0x30] sm:$0xff] }
 0xb9b   :  { %2591 = vmatmul.mubr.msk.f32.vlgmr.msra.gmra.mrb[4].mxu0 %vm246_vm6, %v955_v47 }
 0xc6e   :  { %v2592_v60 = vpop.f32.mrb[4].mxu0 }
 0xc6f   :  { %v1045_v61 = vadd.f32 %v2592_v60, %v2367_v59  ;;  %v1039_v62 = vpop.f32.mrb[5].mxu0 }
 0xc70   :  { %v1040_v63 = vadd.f32 %v2367_v59, %v1039_v62  ;;  %v2374_v59 = vld [vmem:[%s3723_s22] ss:$0 sm:$0xff] }
 0xc71   :  { %v1049_v0 = vmul.f32 %v1045_v61, %v1045_v61 }
 0xc72   :  { %v1048_v1 = vmul.f32 %v1040_v63, %v1040_v63 }
 0xc73   :  { %v1051_v2 = vmul.f32 %v1049_v0, %v1045_v61  ;;  %v2380_v0 = vld [vmem:[%s3762_s9 + $0x1] ss:$0 sm:$0xff] }
 0xc74   :  { %v1050_v4 = vmul.f32 %v1048_v1, %v1040_v63 }
 0xc75   :  { %v1053_v5 = vmul.f32 0.044715, %v1051_v2 }
 0xc76   :  { %v1052_v6 = vmul.f32 0.044715, %v1050_v4 }
 0xc77   :  { %v1055_v7 = vadd.f32 %v1053_v5, %v1045_v61 }
 0xc78   :  { %v1054_v8 = vadd.f32 %v1052_v6, %v1040_v63 }
 0xc79   :  { %v1057_v9 = vmul.f32 0.7978846, %v1055_v7 }
 0xc7a   :  { %v1056_v10 = vmul.f32 0.7978846, %v1054_v8 }
 0xc7b   :  { %2943 = vtanh.f32 %v1057_v9 }
 0xc7c   :  { %2945 = vtanh.f32 %v1056_v10 }
 0xc85   :  { %v2944_v11 = vpop.eup %2943 }
 0xc86   :  { %v2946_v12 = vpop.eup %2945  ;;  %v1061_v13 = vadd.f32 1.0, %v2944_v11 }
 0xc87   :  { %v1060_v14 = vadd.f32 1.0, %v2946_v12 }
 0xc88   :  { %v1063_v15 = vmul.f32 0.5, %v1061_v13 }
 0xc89   :  { %v1062_v16 = vmul.f32 0.5, %v1060_v14 }
 0xc8a   :  { %v1065_v18 = vmul.f32 %v1063_v15, %v1045_v61 }
 0xc8b   :  { %v1064_v17 = vmul.f32 %v1062_v16, %v1040_v63 }
 0xc8d   :  { %2609 = vmatprep.mubr.msk.f32.mxu1 %vm1081_vm14, %v1064_v17 }
 0xc8e   :  { %2610 = vmatmul.mubr.msk.f32.vlgmr.msra.gmra.mrb[12].mxu1 %vm1081_vm14, %v1065_v18 }
 0xd61   :  { %v2611_v25 = vpop.f32.mrb[12].mxu1 }
 0xd62   :  { %v1160_v22 = vadd.f32 %v2611_v25, %v2370_v19  ;;  %v1154_v20 = vpop.f32.mrb[13].mxu1 }
 0xd63   :  { %v1155_v21 = vadd.f32 %v2370_v19, %v1154_v20 }
 0xd64   :  { %v1164_v23 = vadd.f32 %v1160_v22, %v955_v47  ;;  %v2378_v47 = vld [vmem:[%s3759_s4 + $0x38] sm:$0xff] }
 0xd65   :  { %v1163_v24 = vadd.f32 %v1155_v21, %v954_v45  ;;  %v2787_v45 = vpack.c.bf16 %v2376_v44, %v2375_v43  ;;  %v2791_v48 = vpack.c.bf16 %v2378_v47, %v2377_v46 }
 0xd66   :  { %v1170_v26 = vsel %vm246_vm6, %v1164_v23, 0.0 }
 0xd67   :  { %1171 = vadd.xlane.f32.xlu0 %v1170_v26  ;;  %v1167_v27 = vsel %vm246_vm6, %v1163_v24, 0.0  ;;  %2788 = vmatprep.subr.bf16.mxu0 %v2787_v45 }
 0xd68   :  { %1168 = vadd.xlane.f32.xlu1 %v1167_v27  ;;  %2790 = vmatpush3.bf16.msra.mxu0 %v2787_v45 }
 0xd69   :  { %2792 = vmatprep.subr.bf16.mxu0 %v2791_v48 }
 0xd6c   :  { %2794 = vmatpush3.bf16.msra.mxu0 %v2791_v48 }
 0xdf4   :  { %v1172_v28 = vpop.xlane.xlu0 %1171 }
 0xdf5   :  { %v1174_v29 = vmul.f32 0.03125, %v1172_v28  ;;  %v1169_v30 = vpop.xlane.xlu1 %1168 }
 0xdf6   :  { %v1173_v32 = vmul.f32 0.03125, %v1169_v30 }
 0xdf7   :  { %v1176_v33 = vsub.f32 %v1164_v23, %v1174_v29 }
 0xdf8   :  { %v1175_v34 = vsub.f32 %v1163_v24, %v1173_v32 }
 0xdf9   :  { %v1178_v35 = vmul.f32 %v1176_v33, %v1176_v33 }
 0xdfa   :  { %v1177_v40 = vmul.f32 %v1175_v34, %v1175_v34 }
 0xdfb   :  { %v1182_v41 = vsel %vm246_vm6, %v1178_v35, 0.0 }
 0xdfc   :  { %1183 = vadd.xlane.f32.xlu0 %v1182_v41  ;;  %v1179_v42 = vsel %vm246_vm6, %v1177_v40, 0.0 }
 0xdfd   :  { %1180 = vadd.xlane.f32.xlu1 %v1179_v42 }
 0xe89   :  { %v1184_v49 = vpop.xlane.xlu0 %1183 }
 0xe8a   :  { %v1186_v38 = vmul.f32 0.03125, %v1184_v49  ;;  %v1181_v3 = vpop.xlane.xlu1 %1180 }
 0xe8b   :  { %v1185_v52 = vmul.f32 0.03125, %v1181_v3 }
 0xe8c   :  { %v1188_v53 = vadd.f32 1e-12, %v1186_v38 }
 0xe8d   :  { %v1187_v31 = vadd.f32 1e-12, %v1185_v52 }
 0xe8e   :  { %2947 = vrsqrt.f32 %v1188_v53 }
 0xe8f   :  { %2949 = vrsqrt.f32 %v1187_v31 }
 0xe98   :  { %v2948_v54 = vpop.eup %2947 }
 0xe99   :  { %v2950_v56 = vpop.eup %2949  ;;  %v1192_v57 = vmul.f32 %v2948_v54, %v1176_v33 }
 0xe9a   :  { %v1191_v58 = vmul.f32 %v2950_v56, %v1175_v34 }
 0xe9b   :  { %v1200_v60 = vmul.f32 %v2373_v55, %v1192_v57 }
 0xe9c   :  { %v1199_v61 = vmul.f32 %v2373_v55, %v1191_v58 }
 0xe9d   :  { %v3484_v63 = vadd.f32 %v2374_v59, %v1200_v60 }
 0xe9e   :  { %v3482_v62 = vadd.f32 %v2374_v59, %v1199_v61 }
 0xea0   :  { %2620 = vmatprep.mubr.msk.f32.mxu0 %vm246_vm6, %v3482_v62 }
 0xea1   :  { %2621 = vmatmul.mubr.msk.f32.vlgmr.msra.gmra.mrb[6].mxu0 %vm246_vm6, %v3484_v63 }
 0xf74   :  { %v2622_v1 = vpop.f32.mrb[6].mxu0 }
 0xf75   :  { %v1300_v2 = vadd.f32 %v2622_v1, %v2380_v0  ;;  %v1294_v4 = vpop.f32.mrb[7].mxu0 }
 0xf76   :  { %v1295_v5 = vadd.f32 %v2380_v0, %v1294_v4 }
 0xf78   :  { %2627 = vmatprep.mubr.msk.f32.mxu0 %vm415_vm4, %v1295_v5  ;;  %v3494_v6 = vpack.i.bf16 %v1300_v2, %v1295_v5 }
 0xf7a   :  { %2900 = vrot.lane.b32.xlu1 %v3494_v6, %s3041_s6 }
 0xf7e   :  { %2905 = vrot.lane.b32.xlu1 %v3494_v6, %s3045_s11 }
 0xf82   :  { %1501 = vrot.lane.b32.xlu1 %v1295_v5, %s3044_s1 }
 0xf86   :  { %1503 = vrot.lane.b32.xlu1 %v1300_v2, %s3044_s1 }
 0xfec   :  { %v2901_v7 = vpop.permute.xlu1 %2900 }
 0xfed   :  { %v2903_v8 = vunpack.i.h.bf16 %v2901_v7  ;;  %v2902_v9 = vunpack.i.l.bf16 %v2901_v7 }
 0xfef   :  { %v2795_v10 = vpack.c.bf16 %v2903_v8, %v2902_v9 }
 0xff0   :  { %v2906_v11 = vpop.permute.xlu1 %2905 }
 0xff1   :  { %v2908_v12 = vunpack.i.h.bf16 %v2906_v11  ;;  %v2907_v13 = vunpack.i.l.bf16 %v2906_v11  ;;  %2797 = vmatprep.subr.msk.bf16.mxu0 %vm3330_vm7, %v2795_v10  ;;  %v2395_v11 = vld [vmem:[%s3714_s13 + $0x20] sm:$0xff] }
 0xff2   :  { %2800 = vmatpush3.bf16.xpose.msk.msra.mxu0 %vm3330_vm7, %v2795_v10 }
 0xff3   :  { %v2801_v14 = vpack.c.bf16 %v2908_v12, %v2907_v13  ;;  %v2396_v12 = vld [vmem:[%s3714_s13 + $0x28] sm:$0xff] }
 0xff4   :  { %v1502_v46 = vpop.permute.xlu1 %1501  ;;  %v2815_v13 = vpack.c.bf16 %v2396_v12, %v2395_v11  ;;  %v2421_v11 = vld [vmem:[%s3720_s19 + $0x70] sm:$0xff]  ;;  %v2422_v12 = vld [vmem:[%s3720_s19 + $0x78] sm:$0xff] }
 0xff5   :  { %2802 = vmatprep.subr.bf16.mxu0 %v2801_v14 }
 0xff8   :  { %v1504_v47 = vpop.permute.xlu1 %1503 }
 0xff9   :  { %2628 = vmatmul.mubr.msk.f32.vlgmr.msra.gmra.mrb[8].mxu0 %vm415_vm4, %v1300_v2 }
 0xffa   :  { %2804 = vmatpush3.bf16.msra.mxu0 %v2801_v14  ;;  %v2397_v14 = vld [vmem:[%s3714_s13 + $0x30] sm:$0xff] }
0x10cc   :  { %v2629_v15 = vpop.f32.mrb[8].mxu0 }
0x10cd   :  { %v1383_v16 = vpop.f32.mrb[9].mxu0  ;;  %v1389_v18 = vadd.f32 %v2629_v15, %v3347_v50  ;;  %v2398_v15 = vld [vmem:[%s3714_s13 + $0x38] sm:$0xff] }
0x10ce   :  { %v1384_v17 = vadd.f32 %v1383_v16, %v3349_v51  ;;  %v2819_v16 = vpack.c.bf16 %v2398_v15, %v2397_v14  ;;  %v2412_v14 = vld [vmem:[%s3719_s18 + $0x1] ss:$0 sm:$0xff] }
0x10cf   :  { %v1395_v25 = vsel %vm415_vm4, %v1389_v18, -inf }
0x10d0   :  { %v1392_v19 = vsel %vm415_vm4, %v1384_v17, -inf }
0x10d1   :  { %1393 = vmax.xlane.f32.xlu0 %v1392_v19 }
0x10d5   :  { %1396 = vmax.xlane.f32.xlu0 %v1395_v25 }
0x115e   :  { %v1394_v22 = vpop.xlane.xlu0 %1393 }
0x115f   :  { %v1398_v20 = vsub.f32 %v1384_v17, %v1394_v22 }
0x1161   :  { %v1400_v24 = vmul.f32 1.442695, %v1398_v20 }
0x1162   :  { %v1397_v21 = vpop.xlane.xlu0 %1396 }
0x1163   :  { %v1399_v23 = vsub.f32 %v1389_v18, %v1397_v21  ;;  %v2400_v21 = vld [vmem:[%s3715_s14 + $0x1] ss:$0 sm:$0xff] }
0x1165   :  { %v1402_v26 = vmul.f32 1.442695, %v1399_v23 }
0x1167   :  { %2951 = vpow2.f32 %v1402_v26 }
0x1168   :  { %2953 = vpow2.f32 %v1400_v24 }
0x1171   :  { %v2952_v27 = vpop.eup %2951 }
0x1172   :  { %v1407_v28 = vsel %vm415_vm4, %v2952_v27, 0.0  ;;  %v2954_v29 = vpop.eup %2953 }
0x1173   :  { %1408 = vadd.xlane.f32.xlu0 %v1407_v28  ;;  %v1404_v30 = vsel %vm415_vm4, %v2954_v29, 0.0 }
0x1177   :  { %1405 = vadd.xlane.f32.xlu0 %v1404_v30 }
0x118d   :  { %2910 = vrot.lane.b32.xlu0 %v3494_v6, %s3043_s2 }
0x1200   :  { %v1409_v32 = vpop.xlane.xlu0 %1408 }
0x1201   :  { %2955 = vrcp.f32 %v1409_v32 }
0x1204   :  { %v1406_v33 = vpop.xlane.xlu0 %1405 }
0x1205   :  { %2957 = vrcp.f32 %v1406_v33 }
0x1208   :  { %v2911_v34 = vpop.permute.xlu0 %2910 }
0x1209   :  { %v2913_v35 = vunpack.i.h.bf16 %v2911_v34  ;;  %v2912_v40 = vunpack.i.l.bf16 %v2911_v34 }
0x120b   :  { %v2805_v41 = vpack.c.bf16 %v2913_v35, %v2912_v40  ;;  %v2956_v42 = vpop.eup %2955 }
0x120c   :  { %v1413_v45 = vmul.f32 %v2956_v42, %v2952_v27 }
0x120d   :  { %2807 = vmatprep.subr.msk.bf16.mxu0 %vm3330_vm7, %v2805_v41 }
0x120f   :  { %v2958_v43 = vpop.eup %2957 }
0x1210   :  { %v1412_v44 = vmul.f32 %v2958_v43, %v2954_v29 }
0x1212   :  { %2634 = vmatprep.mubr.msk.f32.mxu0 %vm415_vm4, %v1412_v44 }
0x1213   :  { %2635 = vmatmul.mubr.msk.f32.vlgmr.msra.gmra.mrb[10].mxu0 %vm415_vm4, %v1413_v45 }
0x1214   :  { %2810 = vmatpush3.bf16.xpose.msk.msra.mxu0 %vm3330_vm7, %v2805_v41  ;;  %2641 = vmatprep.mubr.msk.f32.mxu0 %vm415_vm4, %v1502_v46  ;;  %v2408_v46 = vld [vmem:[%s3718_s17 + $0x28] sm:$0xff] }
0x121b   :  { %2642 = vmatmul.mubr.msk.f32.vlgmr.msra.gmra.mrb[12].mxu0 %vm415_vm4, %v1504_v47 }
0x12e6   :  { %v2636_v48 = vpop.f32.mrb[10].mxu0 }
0x12e7   :  { %v1492_v49 = vpop.f32.mrb[11].mxu0 }
0x12ee   :  { %v2643_v38 = vpop.f32.mrb[12].mxu0 }
0x12ef   :  { %v1589_v3 = vadd.f32 %v2643_v38, %v3347_v50  ;;  %v1583_v52 = vpop.f32.mrb[13].mxu0 }
0x12f0   :  { %v1584_v53 = vadd.f32 %v1583_v52, %v3349_v51 }
0x12f1   :  { %v1595_v31 = vsel %vm415_vm4, %v1589_v3, -inf }
0x12f2   :  { %1596 = vmax.xlane.f32.xlu0 %v1595_v31  ;;  %v1592_v54 = vsel %vm415_vm4, %v1584_v53, -inf }
0x12f3   :  { %1593 = vmax.xlane.f32.xlu1 %v1592_v54 }
0x1308   :  { %2915 = vrot.lane.b32.xlu0 %v3494_v6, %s3046_s8 }
0x137f   :  { %v1597_v37 = vpop.xlane.xlu0 %1596 }
0x1380   :  { %v1599_v55 = vsub.f32 %v1589_v3, %v1597_v37  ;;  %v1594_v56 = vpop.xlane.xlu1 %1593 }
0x1381   :  { %v1598_v57 = vsub.f32 %v1584_v53, %v1594_v56  ;;  %v2405_v56 = vld [vmem:[%s3716_s15 + $0x1] ss:$0 sm:$0xff]  ;;  %s2303_s15 = sshll.u32 %s3048_s7, 4  ;;  %s2304_s15 = int_to_ptr.vmem [resolvable:$true] %s2303_s15 }
0x1382   :  { %v1602_v58 = vmul.f32 1.442695, %v1599_v55  ;;  %s2989_s30 = scalar_lea.vmem %s2304_s15, 256  ;;  %p2994_p1 = scmp.lt.s32.totalorder %s2304_s15, %s2304_s15 }
0x1383   :  { %v1600_v59 = vmul.f32 1.442695, %v1598_v57  ;;  %v2916_v60 = vpop.permute.xlu0 %2915  ;;  %p2990_p0 = scmp.ne.s32.totalorder %s2304_s15, %s2989_s30  ;;  %p2995_p2 = scmp.lt.s32.totalorder %s2989_s30, %s2989_s30 }
0x1384   :  { %v2918_v50 = vunpack.i.h.bf16 %v2916_v60  ;;  %v2917_v61 = vunpack.i.l.bf16 %v2916_v60 }
0x1385   :  { %2959 = vpow2.f32 %v1600_v59  ;;  %p2996_p3 = por %p2995_p2, %p2994_p1 }
0x1386   :  { %v2811_v51 = vpack.c.bf16 %v2918_v50, %v2917_v61  ;;  %2961 = vpow2.f32 %v1602_v58  ;;  %v2406_v58 = vld [vmem:[%s3717_s16 + $0x1] ss:$0 sm:$0xff] }
0x1387   :  { %p2997_p4 = pnand %p2996_p3, %p2990_p0 }
0x1388   :  { %2812 = vmatprep.subr.bf16.mxu1 %v2811_v51 }
0x1389   :  { %2814 = vmatpush3.bf16.msra.mxu1 %v2811_v51 }
0x138a   :  { %2816 = vmatprep.subr.bf16.mxu1 %v2815_v13 }
0x138f   :  { %v2960_v0 = vpop.eup %2959 }
0x1390   :  { %v1604_v1 = vsel %vm415_vm4, %v2960_v0, 0.0  ;;  %v2962_v2 = vpop.eup %2961 }
0x1391   :  { %1605 = vadd.xlane.f32.xlu1 %v1604_v1  ;;  %v1607_v4 = vsel %vm415_vm4, %v2962_v2, 0.0  ;;  %v2415_v1 = vld [vmem:[%s3720_s19 + $0x40] sm:$0xff] }
0x1395   :  { %1608 = vadd.xlane.f32.xlu1 %v1607_v4 }
0x141e   :  { %v1606_v5 = vpop.xlane.xlu1 %1605 }
0x141f   :  { %2963 = vrcp.f32 %v1606_v5  ;;  %v2417_v5 = vld [vmem:[%s3720_s19 + $0x50] sm:$0xff] }
0x1422   :  { %v1609_v6 = vpop.xlane.xlu1 %1608 }
0x1423   :  { %2965 = vrcp.f32 %v1609_v6  ;;  %v2418_v6 = vld [vmem:[%s3720_s19 + $0x58] sm:$0xff] }
0x1429   :  { %v2964_v7 = vpop.eup %2963 }
0x142a   :  { %v1612_v8 = vmul.f32 %v2964_v7, %v2960_v0  ;;  %v2835_v7 = vpack.c.bf16 %v2418_v6, %v2417_v5 }
0x142c   :  { %2648 = vmatprep.mubr.msk.f32.mxu1 %vm415_vm4, %v1612_v8  ;;  %v2419_v8 = vld [vmem:[%s3720_s19 + $0x60] sm:$0xff] }
0x142d   :  { %v2966_v9 = vpop.eup %2965 }
0x142e   :  { %v1613_v10 = vmul.f32 %v2966_v9, %v2962_v2  ;;  %v2416_v2 = vld [vmem:[%s3720_s19 + $0x48] sm:$0xff] }
0x142f   :  { %v2831_v4 = vpack.c.bf16 %v2416_v2, %v2415_v1  ;;  %v2420_v9 = vld [vmem:[%s3720_s19 + $0x68] sm:$0xff] }
0x1430   :  { %2649 = vmatmul.mubr.msk.f32.vlgmr.msra.gmra.mrb[14].mxu1 %vm415_vm4, %v1613_v10  ;;  %v2839_v10 = vpack.c.bf16 %v2420_v9, %v2419_v8 }
0x1431   :  { %2818 = vmatpush3.bf16.msra.mxu1 %v2815_v13  ;;  %v2843_v13 = vpack.c.bf16 %v2422_v12, %v2421_v11 }
0x1432   :  { %2820 = vmatprep.subr.bf16.mxu1 %v2819_v16 }
0x1435   :  { %2822 = vmatpush3.bf16.msra.mxu1 %v2819_v16 }
0x1436   :  { %2832 = vmatprep.subr.bf16.mxu1 %v2831_v4 }
0x1503   :  { %v2650_v17 = vpop.f32.mrb[14].mxu1 }
0x1504   :  { %v1692_v18 = vpop.f32.mrb[15].mxu1 }
0x1505   :  { %1703 = vrot.lane.b32.xlu1 %v1692_v18, %s3767_s12 }
0x1509   :  { %1705 = vrot.lane.b32.xlu1 %v2650_v17, %s3767_s12 }
0x1577   :  { %v1704_v19 = vpop.permute.xlu1 %1703 }
0x1578   :  { %v1709_v25 = vsel %vm415_vm4, %v1492_v49, %v1704_v19  ;;  %v2410_v49 = vld [vmem:[%s3718_s17 + $0x38] sm:$0xff] }
0x1579   :  { %2659 = vmatprep.mubr.msk.f32.mxu1 %vm246_vm6, %v1709_v25 }
0x157b   :  { %v1706_v22 = vpop.permute.xlu1 %1705 }
0x157c   :  { %v1710_v20 = vsel %vm415_vm4, %v2636_v48, %v1706_v22  ;;  %v2409_v48 = vld [vmem:[%s3718_s17 + $0x30] sm:$0xff] }
0x157d   :  { %2660 = vmatmul.mubr.msk.f32.vlgmr.msra.gmra.mrb[16].mxu1 %vm246_vm6, %v1710_v20  ;;  %v2827_v38 = vpack.c.bf16 %v2410_v49, %v2409_v48 }
0x157e   :  { %2834 = vmatpush3.bf16.msra.mxu1 %v2831_v4 }
0x157f   :  { %2836 = vmatprep.subr.bf16.mxu1 %v2835_v7 }
0x1582   :  { %2838 = vmatpush3.bf16.msra.mxu1 %v2835_v7  ;;  %v2429_v7 = vld [vmem:[%s3722_s21 + $0x1] ss:$0 sm:$0xff] }
0x1583   :  { %2840 = vmatprep.subr.bf16.mxu1 %v2839_v10 }
0x1586   :  { %2842 = vmatpush3.bf16.msra.mxu1 %v2839_v10  ;;  %v2430_v10 = vld [vmem:[%s3723_s22 + $0x1] ss:$0 sm:$0xff] }
0x1587   :  { %2844 = vmatprep.subr.bf16.mxu1 %v2843_v13 }
0x158a   :  { %2846 = vmatpush3.bf16.msra.mxu1 %v2843_v13 }
0x1650   :  { %v2661_v23 = vpop.f32.mrb[16].mxu1 }
0x1651   :  { %v1802_v24 = vadd.f32 %v2661_v23, %v2400_v21  ;;  %v1796_v26 = vpop.f32.mrb[17].mxu1 }
0x1652   :  { %v1797_v27 = vadd.f32 %v2400_v21, %v1796_v26 }
0x1653   :  { %v1806_v28 = vadd.f32 %v1802_v24, %v3484_v63 }
0x1654   :  { %v1805_v29 = vadd.f32 %v1797_v27, %v3482_v62  ;;  %v2407_v62 = vld [vmem:[%s3718_s17 + $0x20] sm:$0xff] }
0x1655   :  { %v1814_v30 = vsel %vm246_vm6, %v1806_v28, 0.0  ;;  %v2823_v47 = vpack.c.bf16 %v2408_v46, %v2407_v62 }
0x1656   :  { %1815 = vadd.xlane.f32.xlu1 %v1814_v30  ;;  %v1811_v32 = vsel %vm246_vm6, %v1805_v29, 0.0 }
0x1657   :  { %1812 = vadd.xlane.f32.xlu0 %v1811_v32  ;;  %2824 = vmatprep.subr.bf16.mxu0 %v2823_v47 }
0x1658   :  { %2826 = vmatpush3.bf16.msra.mxu0 %v2823_v47 }
0x1659   :  { %2828 = vmatprep.subr.bf16.mxu0 %v2827_v38 }
0x165c   :  { %2830 = vmatpush3.bf16.msra.mxu0 %v2827_v38 }
0x16e3   :  { %v1816_v33 = vpop.xlane.xlu1 %1815 }
0x16e4   :  { %v1818_v34 = vmul.f32 0.03125, %v1816_v33  ;;  %v1813_v35 = vpop.xlane.xlu0 %1812 }
0x16e5   :  { %v1817_v40 = vmul.f32 0.03125, %v1813_v35 }
0x16e6   :  { %v1820_v41 = vsub.f32 %v1806_v28, %v1818_v34 }
0x16e7   :  { %v1819_v42 = vsub.f32 %v1805_v29, %v1817_v40 }
0x16e8   :  { %v1822_v45 = vmul.f32 %v1820_v41, %v1820_v41 }
0x16e9   :  { %v1821_v43 = vmul.f32 %v1819_v42, %v1819_v42 }
0x16ea   :  { %v1826_v63 = vsel %vm246_vm6, %v1822_v45, 0.0 }
0x16eb   :  { %v1823_v44 = vsel %vm246_vm6, %v1821_v43, 0.0 }
0x16ec   :  { %1824 = vadd.xlane.f32.xlu0 %v1823_v44 }
0x16f0   :  { %1827 = vadd.xlane.f32.xlu0 %v1826_v63 }
0x1779   :  { %v1825_v3 = vpop.xlane.xlu0 %1824 }
0x177a   :  { %v1829_v52 = vmul.f32 0.03125, %v1825_v3 }
0x177c   :  { %v1831_v53 = vadd.f32 1e-12, %v1829_v52 }
0x177d   :  { %v1828_v31 = vpop.xlane.xlu0 %1827 }
0x177e   :  { %2967 = vrsqrt.f32 %v1831_v53  ;;  %v1830_v54 = vmul.f32 0.03125, %v1828_v31 }
0x1780   :  { %v1832_v37 = vadd.f32 1e-12, %v1830_v54 }
0x1782   :  { %2969 = vrsqrt.f32 %v1832_v37 }
0x1788   :  { %v2968_v55 = vpop.eup %2967 }
0x1789   :  { %v1835_v57 = vmul.f32 %v2968_v55, %v1819_v42  ;;  %v2424_v42 = vld [vmem:[%s3721_s20 + $0x1] ss:$0 sm:$0xff] }
0x178b   :  { %v1843_v59 = vmul.f32 %v2405_v56, %v1835_v57  ;;  %v2113_v57 = vld [vmem:[%s3724_s23] sm:$0xff] }
0x178c   :  { %v2970_v60 = vpop.eup %2969 }
0x178d   :  { %v1836_v50 = vmul.f32 %v2970_v60, %v1820_v41  ;;  %v1851_v61 = vadd.f32 %v2406_v58, %v1843_v59  ;;  %v2115_v60 = vld [vmem:[%s3724_s23 + $0x10] sm:$0xff] }
0x178f   :  { %v1844_v51 = vmul.f32 %v2405_v56, %v1836_v50  ;;  %2670 = vmatprep.mubr.msk.f32.mxu0 %vm246_vm6, %v1851_v61  ;;  %v2116_v50 = vld [vmem:[%s3724_s23 + $0x18] sm:$0xff] }
0x1791   :  { %v1852_v0 = vadd.f32 %v2406_v58, %v1844_v51  ;;  %v2114_v58 = vld [vmem:[%s3724_s23 + $0x8] sm:$0xff] }
0x1792   :  { %v2847_v59 = vpack.c.bf16 %v2114_v58, %v2113_v57 }
0x1793   :  { %2671 = vmatmul.mubr.msk.f32.vlgmr.msra.gmra.mrb[14].mxu0 %vm246_vm6, %v1852_v0 }
0x1794   :  { %2848 = vmatprep.subr.bf16.mxu0 %v2847_v59 }
0x1795   :  { %2850 = vmatpush3.bf16.msra.mxu0 %v2847_v59 }
0x1866   :  { %v2672_v15 = vpop.f32.mrb[14].mxu0 }
0x1867   :  { %v1944_v16 = vadd.f32 %v2672_v15, %v2412_v14  ;;  %v1938_v17 = vpop.f32.mrb[15].mxu0 }
0x1868   :  { %v1939_v18 = vadd.f32 %v2412_v14, %v1938_v17 }
0x1869   :  { %v1948_v19 = vmul.f32 %v1944_v16, %v1944_v16 }
0x186a   :  { %v1947_v25 = vmul.f32 %v1939_v18, %v1939_v18 }
0x186b   :  { %v1950_v22 = vmul.f32 %v1948_v19, %v1944_v16 }
0x186c   :  { %v1949_v20 = vmul.f32 %v1947_v25, %v1939_v18 }
0x186d   :  { %v1952_v21 = vmul.f32 0.044715, %v1950_v22 }
0x186e   :  { %v1951_v23 = vmul.f32 0.044715, %v1949_v20 }
0x186f   :  { %v1954_v24 = vadd.f32 %v1952_v21, %v1944_v16 }
0x1870   :  { %v1953_v26 = vadd.f32 %v1951_v23, %v1939_v18 }
0x1871   :  { %v1956_v27 = vmul.f32 0.7978846, %v1954_v24 }
0x1872   :  { %v1955_v28 = vmul.f32 0.7978846, %v1953_v26 }
0x1873   :  { %2971 = vtanh.f32 %v1956_v27 }
0x1874   :  { %2973 = vtanh.f32 %v1955_v28 }
0x187d   :  { %v2972_v29 = vpop.eup %2971 }
0x187e   :  { %v2974_v30 = vpop.eup %2973  ;;  %v1960_v32 = vadd.f32 1.0, %v2972_v29  ;;  %v2209_v29 = vld [vmem:[%s3768_s29] sm:$0xff] }
0x187f   :  { %v1959_v33 = vadd.f32 1.0, %v2974_v30  ;;  %vm2211_vm15 = vcmp.eq.s32.totalorder %v2209_v29, 1 }
0x1880   :  { %v1962_v34 = vmul.f32 0.5, %v1960_v32  ;;  %v2210_v32 = vld [vmem:[%s3768_s29 + $0x8] sm:$0xff] }
0x1881   :  { %v1961_v35 = vmul.f32 0.5, %v1959_v33  ;;  %vm2212_vm0 = vcmp.eq.s32.totalorder %v2210_v32, 1 }
0x1882   :  { %v1964_v41 = vmul.f32 %v1962_v34, %v1944_v16  ;;  %v2431_v16 = vld [vmem:[%s3725_s24] ss:$0 sm:$0xff] }
0x1883   :  { %v1963_v40 = vmul.f32 %v1961_v35, %v1939_v18 }
0x1885   :  { %2689 = vmatprep.mubr.msk.f32.mxu1 %vm1081_vm14, %v1963_v40 }
0x1886   :  { %2690 = vmatmul.mubr.msk.f32.vlgmr.msra.gmra.mrb[18].mxu1 %vm1081_vm14, %v1964_v41 }
0x1959   :  { %v2691_v43 = vpop.f32.mrb[18].mxu1 }
0x195a   :  { %v2060_v44 = vadd.f32 %v2691_v43, %v2424_v42  ;;  %v2054_v45 = vpop.f32.mrb[19].mxu1 }
0x195b   :  { %v2055_v63 = vadd.f32 %v2424_v42, %v2054_v45 }
0x195c   :  { %v2064_v62 = vadd.f32 %v2060_v44, %v1852_v0 }
0x195d   :  { %v2063_v46 = vadd.f32 %v2055_v63, %v1851_v61  ;;  %v2851_v61 = vpack.c.bf16 %v2116_v50, %v2115_v60 }
0x195e   :  { %v2072_v47 = vsel %vm246_vm6, %v2064_v62, 0.0 }
0x195f   :  { %2073 = vadd.xlane.f32.xlu0 %v2072_v47  ;;  %v2069_v48 = vsel %vm246_vm6, %v2063_v46, 0.0  ;;  %2852 = vmatprep.subr.bf16.mxu0 %v2851_v61 }
0x1960   :  { %2070 = vadd.xlane.f32.xlu1 %v2069_v48  ;;  %2854 = vmatpush3.bf16.msra.mxu0 %v2851_v61 }
0x19ec   :  { %v2074_v49 = vpop.xlane.xlu0 %2073 }
0x19ed   :  { %v2076_v38 = vmul.f32 0.03125, %v2074_v49  ;;  %v2071_v3 = vpop.xlane.xlu1 %2070 }
0x19ee   :  { %v2075_v52 = vmul.f32 0.03125, %v2071_v3 }
0x19ef   :  { %v2078_v53 = vsub.f32 %v2064_v62, %v2076_v38 }
0x19f0   :  { %v2077_v31 = vsub.f32 %v2063_v46, %v2075_v52 }
0x19f1   :  { %v2080_v54 = vmul.f32 %v2078_v53, %v2078_v53 }
0x19f2   :  { %v2079_v37 = vmul.f32 %v2077_v31, %v2077_v31 }
0x19f3   :  { %v2084_v55 = vsel %vm246_vm6, %v2080_v54, 0.0 }
0x19f4   :  { %2085 = vadd.xlane.f32.xlu0 %v2084_v55  ;;  %v2081_v56 = vsel %vm246_vm6, %v2079_v37, 0.0 }
0x19f5   :  { %2082 = vadd.xlane.f32.xlu1 %v2081_v56 }
0x1a81   :  { %v2086_v51 = vpop.xlane.xlu0 %2085 }
0x1a82   :  { %v2088_v0 = vmul.f32 0.03125, %v2086_v51  ;;  %v2083_v1 = vpop.xlane.xlu1 %2082 }
0x1a83   :  { %v2087_v2 = vmul.f32 0.03125, %v2083_v1 }
0x1a84   :  { %v2090_v4 = vadd.f32 1e-12, %v2088_v0 }
0x1a85   :  { %v2089_v5 = vadd.f32 1e-12, %v2087_v2 }
0x1a86   :  { %2975 = vrsqrt.f32 %v2090_v4 }
0x1a87   :  { %2977 = vrsqrt.f32 %v2089_v5 }
0x1a90   :  { %v2976_v6 = vpop.eup %2975 }
0x1a91   :  { %v2978_v8 = vpop.eup %2977  ;;  %v2094_v9 = vmul.f32 %v2976_v6, %v2078_v53 }
0x1a92   :  { %v2093_v11 = vmul.f32 %v2978_v8, %v2077_v31 }
0x1a93   :  { %v2102_v12 = vmul.f32 %v2429_v7, %v2094_v9 }
0x1a94   :  { %v2101_v13 = vmul.f32 %v2429_v7, %v2093_v11 }
0x1a95   :  { %v2110_v14 = vadd.f32 %v2430_v10, %v2102_v12 }
0x1a96   :  { %v2109_v15 = vadd.f32 %v2430_v10, %v2101_v13 }
0x1a97   :  { %2112 = vst.msk [vmem:[#allocation2 + $0x8] sm:$0xff] %vm246_vm6, %v2110_v14 }
0x1a98   :  { %2700 = vmatprep.mubr.msk.f32.mxu0 %vm246_vm6, %v2109_v15  ;;  %2111 = vst.msk [vmem:[#allocation2] sm:$0xff] %vm246_vm6, %v2109_v15 }
0x1a99   :  { %2701 = vmatmul.mubr.msk.f32.vlgmr.msra.gmra.mrb[16].mxu0 %vm246_vm6, %v2110_v14  ;;  %vm2263_vm6 = vcmask 7168  }
0x1b6c   :  { %v2702_v17 = vpop.f32.mrb[16].mxu0 }
0x1b6d   :  { %v2202_v18 = vadd.f32 %v2702_v17, %v2431_v16  ;;  %v2196_v19 = vpop.f32.mrb[17].mxu0 }
0x1b6e   :  { %v2197_v25 = vadd.f32 %v2431_v16, %v2196_v19 }
0x1b6f   :  { %2206 = vst [vmem:[%s3727_s26 + $0x8] sm:$0xff] %v2202_v18  ;;  %2217 = vmax.xlane.f32.xlu0 %v2202_v18 }
0x1b70   :  { %2205 = vst [vmem:[%s3727_s26] sm:$0xff] %v2197_v25  ;;  %2215 = vmax.xlane.f32.xlu1 %v2197_v25  ;;  %s3769_s26 = sld [smem:[#allocation14_spill]] }
0x1b76   :  { %v2207_v30 = vld [vmem:[%s3769_s26] sm:$0xff]  ;;  %v2208_v34 = vld [vmem:[%s3769_s26 + $0x8] sm:$0xff] }
0x1b77   :  { %v2213_v33 = vsel %vm2211_vm15, %v2207_v30, 4294967196  ;;  %v2214_v35 = vsel %vm2212_vm0, %v2208_v34, 4294967196 }
0x1b78   :  { %vm2255_vm1 = vcmp.ne.s32.totalorder %v2213_v33, 4294967196  ;;  %vm2256_vm2 = vcmp.ne.s32.totalorder %v2214_v35, 4294967196 }
0x1b79   :  { %v2436_v62 = vsel %vm2255_vm1, 1.0, %v3039_v36  ;;  %v2437_v47 = vsel %vm2256_vm2, 1.0, %v3039_v36 }
0x1b7a   :  { %v2266_v53 = vsel %vm2263_vm6, %v2436_v62, 0.0  ;;  %v2267_v31 = vsel %vm2263_vm6, %v2437_v47, 0.0 }
0x1b7b   :  { %v2268_v37 = vadd.f32 %v2267_v31, %v2266_v53 }
0x1bfc   :  { %v2218_v22 = vpop.xlane.xlu0 %2217 }
0x1bfd   :  { %v2220_v20 = vsub.f32 %v2202_v18, %v2218_v22  ;;  %v2216_v21 = vpop.xlane.xlu1 %2215 }
0x1bfe   :  { %v2219_v23 = vsub.f32 %v2197_v25, %v2216_v21 }
0x1bff   :  { %v2223_v24 = vmul.f32 1.442695, %v2220_v20 }
0x1c00   :  { %v2221_v26 = vmul.f32 1.442695, %v2219_v23 }
0x1c01   :  { %2979 = vpow2.f32 %v2223_v24 }
0x1c02   :  { %2981 = vpow2.f32 %v2221_v26 }
0x1c0b   :  { %v2980_v27 = vpop.eup %2979 }
0x1c0c   :  { %v2982_v28 = vpop.eup %2981  ;;  %2227 = vadd.xlane.f32.xlu0 %v2980_v27 }
0x1c0d   :  { %2225 = vadd.xlane.f32.xlu1 %v2982_v28 }
0x1c1e   :  { %2236 = vperm.xlu1 %2878, %v2213_v33  }
0x1c22   :  { %2239 = vperm.xlu0 %2877, %v2214_v35  }
0x1c99   :  { %v2228_v40 = vpop.xlane.xlu0 %2227 }
0x1c9a   :  { %2983 = vlog2.f32 %v2228_v40  ;;  %v2226_v41 = vpop.xlane.xlu1 %2225 }
0x1c9b   :  { %2985 = vlog2.f32 %v2226_v41 }
0x1c9e   :  { %v2237_v43 = vpop.permute.xlu1 %2236 }
0x1c9f   :  { %vm2241_vm5 = vcmp.eq.s32.totalorder %v3271_v39, %v2237_v43 }
0x1ca0   :  { %v2434_v3 = vsel %vm2241_vm5, 1.0, %v3039_v36 }
0x1ca1   :  { %v2240_v42 = vpop.permute.xlu0 %2239 }
0x1ca2   :  { %vm2242_vm3 = vcmp.eq.s32.totalorder %v3271_v39, %v2240_v42 }
0x1ca3   :  { %v2435_v49 = vsel %vm2242_vm3, 1.0, %v3039_v36 }
0x1ca4   :  { %v2984_v44 = vpop.eup %2983 }
0x1ca5   :  { %v2986_v45 = vpop.eup %2985  ;;  %v2232_v63 = vmul.f32 0.6931472, %v2984_v44 }
0x1ca6   :  { %v2230_v46 = vmul.f32 0.6931472, %v2986_v45 }
0x1ca7   :  { %v2234_v48 = vsub.f32 %v2220_v20, %v2232_v63 }
0x1ca8   :  { %v2233_v38 = vsub.f32 %v2219_v23, %v2230_v46 }
0x1ca9   :  { %v2248_v52 = vmul.f32 %v2435_v49, %v2234_v48 }
0x1caa   :  { %v2247_v54 = vmul.f32 %v2434_v3, %v2233_v38 }
0x1cab   :  { %2251 = vadd.xlane.f32.xlu0 %v2248_v52 }
0x1cac   :  { %2249 = vadd.xlane.f32.xlu1 %v2247_v54 }
0x1cb0   :  { %2269 = vadd.xlane.f32.xlu1 %v2268_v37 }
0x1d38   :  { %v2252_v39 = vpop.xlane.xlu0 %2251 }
0x1d39   :  { %v2254_v55 = vsub.f32 0.0, %v2252_v39  ;;  %v2250_v56 = vpop.xlane.xlu1 %2249 }
0x1d3a   :  { %v2253_v57 = vsub.f32 0.0, %v2250_v56 }
0x1d3b   :  { %v2262_v58 = vmul.f32 %v2437_v47, %v2254_v55 }
0x1d3c   :  { %v2261_v59 = vmul.f32 %v2436_v62, %v2253_v57 }
0x1d3d   :  { %2265 = vst.msk [vmem:[%s3729_s28 + $0x8] sm:$0xff] %vm2263_vm6, %v2262_v58  ;;  %v2279_v36 = vsel %vm2263_vm6, %v2262_v58, 0.0  ;;  %v2270_v60 = vpop.xlane.xlu1 %2269 }
0x1d3e   :  { %2264 = vst.msk [vmem:[%s3729_s28] sm:$0xff] %vm2263_vm6, %v2261_v59  ;;  %v2278_v50 = vsel %vm2263_vm6, %v2261_v59, 0.0  ;;  %v2271_v61 = vrot.slane %v2270_v60, 4 }
0x1d3f   :  { %v2280_v51 = vadd.f32 %v2279_v36, %v2278_v50 }
0x1d40   :  { %v2272_v0 = vadd.f32 %v2271_v61, %v2270_v60 }
0x1d41   :  { %2281 = vadd.xlane.f32.xlu0 %v2280_v51 }
0x1d42   :  { %v2273_v1 = vrot.slane %v2272_v0, 2 }
0x1d44   :  { %v2274_v2 = vadd.f32 %v2273_v1, %v2272_v0 }
0x1d46   :  { %v2275_v4 = vrot.slane %v2274_v2, 1 }
0x1d48   :  { %v2276_v5 = vadd.f32 %v2275_v4, %v2274_v2 }
0x1d4a   :  { %2855 = vpush %v2276_v5 }
0x1d4b   :  { %3000 = shalt.err (!%p2997_p4)
}
0x1d4c   :  { %s3001_s12 = scalar_lea.hbm %s3726_s25, 256 }
0x1d4d   :  { %p3002_p5 = scmp.ne.s32.totalorder %s3726_s25, %s3001_s12  ;;  %p3005_p6 = scmp.lt.u32.totalorder %s3001_s12, %s3726_s25 }
0x1d4f   :  { %p3007_p7 = pnand %p3005_p6, %p3002_p5 }
0x1d51   :  { %3010 = shalt.err (!%p3007_p7)
}
0x1d52   :  { %s3049_s14 = smov 128   ;;  %s3050_s22 = smov 8   ;;  %vm2296_vm4 = vcmask 0  }
0x1d53   :  { %2309 = dma.vmem_to_hbm [thread:$0]  %s2304_s15, 256, %s3726_s25, [#allocation3], %s3049_s14, %s3049_s14, %s3050_s22  }
0x1d54   :  { %s3051_s24 = smov 1.0   ;;  %s3052_s9 = smov [#allocation4]  }
0x1d55   :  { %s2318_s6 = sshll.u32 %s3052_s9, 4  ;;  %s2319_s6 = int_to_ptr.vmem [resolvable:$true] %s2318_s6 }
0x1d56   :  { %s3011_s2 = scalar_lea.vmem %s2319_s6, 16  ;;  %s3015_s1 = scalar_lea.vmem %s2319_s6, 32 }
0x1d57   :  { %p3012_p8 = scmp.ne.s32.totalorder %s2319_s6, %s3011_s2  ;;  %p3016_p9 = scmp.lt.s32.totalorder %s2319_s6, %s2319_s6 }
0x1d58   :  { %p3017_p10 = scmp.lt.s32.totalorder %s3015_s1, %s3011_s2 }
0x1d5a   :  { %p3018_p11 = por %p3017_p10, %p3016_p9 }
0x1d5c   :  { %p3019_p12 = pnand %p3018_p11, %p3012_p8 }
0x1d7b   :  { %s2856_s0 = spop %2855 }
0x1d7c   :  { %s2290_s5 = smax.f32 %s3051_s24, %s2856_s0 }
0x1d7d   :  { %v2291_v6 = vstv %s2290_s5 }
0x1d7e   :  { %2987 = vrcp.f32 %v2291_v6 }
0x1d88   :  { %v2988_v14 = vpop.eup %2987 }
0x1dce   :  { %v2282_v7 = vpop.xlane.xlu0 %2281 }
0x1dcf   :  { %v2283_v8 = vrot.slane %v2282_v7, 4 }
0x1dd1   :  { %v2284_v9 = vadd.f32 %v2283_v8, %v2282_v7 }
0x1dd3   :  { %v2285_v10 = vrot.slane %v2284_v9, 2 }
0x1dd5   :  { %v2286_v11 = vadd.f32 %v2285_v10, %v2284_v9 }
0x1dd7   :  { %v2287_v12 = vrot.slane %v2286_v11, 1 }
0x1dd9   :  { %v2288_v13 = vadd.f32 %v2287_v12, %v2286_v11 }
0x1ddb   :  { %2857 = vpush %v2288_v13 }
0x1ddc   :  { %2859 = vpush %v2988_v14 }
0x1e0c   :  { %s2858_s29 = spop %2857 }
0x1e0d   :  { %s2860_s26 = spop %2859 }
0x1e0e   :  { %s2294_s25 = smul.f32 %s2860_s26, %s2858_s29 }
0x1e10   :  { %v2295_v15 = vstv %s2294_s25 }
0x1e11   :  { %2297 = vst.msk [vmem:[#allocation4] sm:$0x1] %vm2296_vm4, %v2295_v15 }
0x1e12   :  { %3022 = shalt.err (!%p3019_p12)
}
0x1e13   :  { %s3023_s20 = scalar_lea.hbm %s3728_s27, 16 }
0x1e14   :  { %p3024_p13 = scmp.ne.s32.totalorder %s3728_s27, %s3023_s20  ;;  %p3027_p0 = scmp.lt.u32.totalorder %s3023_s20, %s3728_s27 }
0x1e16   :  { %p3029_p1 = pnand %p3027_p0, %p3024_p13 }
0x1e18   :  { %3032 = shalt.err (!%p3029_p1)
}
0x1e19   :  { %2321 = dma.vmem_to_hbm [thread:$0]  %s2319_s6, 16, %s3728_s27, [#allocation5]  }
0x1e1a   :  { %3033 = dma.done.wait [#allocation3], 256  }
0x1e1b   :  { %3034 = vsyncadd [#allocation3], 4294967040 }
0x1e1c   :  { %3035 = dma.done.wait [#allocation5], 16  }
0x1e1d   :  { %3036 = vsyncadd [#allocation5], 4294967280 }
0x1e1e   :  { %2334 = vsyncpa [#allocation3], 1 }
0x1e1f   :  { %2335 = vsyncpa [#allocation5], 1 }

</bundles_post_ra>
